<compile_context>
chip_gen: v7x
topology: tpu7x:2x2x1
jax: 0.10.0
libtpu: 0.0.40
codegen_flags: <defaults>
</compile_context>

<pallas_src>
import numpy as np
import jax
import jax.numpy as jnp
from jax.experimental import pallas as pl
from jax.experimental.pallas import tpu as pltpu

# ----------------------------- configuration ------------------------------
B = 2                     # batch
H = W = 8                 # spatial resolution
C = 32                    # embedding dim
NUM_HEADS = 4
DH = C // NUM_HEADS
WS = 4                    # window size
SHIFT = 2                 # shift size (SW-MSA)
N = WS * WS               # tokens per window
NWH, NWW = H // WS, W // WS
NW = NWH * NWW            # windows per image
WPT = 2                   # windows per grid step (re-derive vs VMEM budget at real sizes)
assert NW % WPT == 0
TT = WPT * N              # tokens handled per grid step
MLP_HIDDEN = int(C * 4.0)
SCALE = DH ** (-0.5)
EPS = 1e-5
DTYPE = jnp.float32
MXU_DTYPE = jnp.bfloat16  # MXU operand dtype (f32 accumulation everywhere)

# Single-buffer the resident (constant index_map) operands; guarded so the script still
# runs on a jax without BlockSpec.pipeline_mode / pl.Buffered.
try:
    pl.BlockSpec((8, 128), lambda i: (0, 0), pipeline_mode=pl.Buffered(1))
    _CONST_BUF = {"pipeline_mode": pl.Buffered(1)}
except Exception:
    _CONST_BUF = {}


def _const_spec(shape):
    """BlockSpec for an operand that is identical for every grid step (kept resident)."""
    if len(shape) == 2:
        imap = lambda b, j: (0, 0)
    else:
        imap = lambda b, j: (0, 0, 0)
    return pl.BlockSpec(shape, imap, **_CONST_BUF)


# ------------------------------ shared helper -------------------------------
def _layernorm(x, g, b):
    mu = jnp.mean(x, axis=-1, keepdims=True)
    var = jnp.mean((x - mu) ** 2, axis=-1, keepdims=True)
    return (x - mu) * jax.lax.rsqrt(var + EPS) * g + b


# ------------------------------ fused Pallas kernel -------------------------
def swin_block_kernel(x_ref, mask_ref, rel_ref,
                      g1_ref, b1_ref, wqkv_ref, bqkv_ref, wproj_ref, bproj_ref,
                      g2_ref, b2_ref, w1_ref, bb1_ref, w2_ref, bb2_ref,
                      o_ref):
    """One grid step = WPT windows of one image, full Swin block in windowed token order."""
    x = x_ref[0].reshape(TT, C)                               # (TT, C) f32, shifted+windowed

    # ---- norm1 + QKV projection for all WPT windows in one matmul ----------
    xn = _layernorm(x, g1_ref[0], b1_ref[0])                  # f32
    qkv = jnp.dot(xn.astype(MXU_DTYPE), wqkv_ref[...],
                  preferred_element_type=jnp.float32) + bqkv_ref[0]     # (TT, 3C) f32
    qkv = qkv.reshape(WPT, N, 3 * C)

    mask = mask_ref[...]                                      # (WPT, N, N) f32 shift mask
    rel = rel_ref[...]                                        # (heads, N, N) f32 rel-pos bias
    wproj = wproj_ref[...]                                    # (heads, DH, C) bf16

    # ---- per-window multi-head attention (window-batched einsums) ----------
    acc = None
    for h in range(NUM_HEADS):                                # static unroll
        q = (qkv[:, :, h * DH:(h + 1) * DH] * SCALE).astype(MXU_DTYPE)          # (WPT,N,DH)
        k = qkv[:, :, C + h * DH:C + (h + 1) * DH].astype(MXU_DTYPE)
        v = qkv[:, :, 2 * C + h * DH:2 * C + (h + 1) * DH].astype(MXU_DTYPE)
        s = jnp.einsum("wnd,wmd->wnm", q, k,
                       preferred_element_type=jnp.float32)                       # (WPT,N,N)
        s = s + rel[h] + mask                                 # f32 bias added after f32 accum
        s = s - jnp.max(s, axis=-1, keepdims=True)
        p = jnp.exp(s)
        p = p * pl.reciprocal(jnp.sum(p, axis=-1, keepdims=True), approx=True)
        o_h = jnp.einsum("wnm,wmd->wnd", p.astype(MXU_DTYPE), v,
                         preferred_element_type=jnp.float32)                      # (WPT,N,DH)
        contrib = jnp.dot(o_h.reshape(TT, DH).astype(MXU_DTYPE), wproj[h],
                          preferred_element_type=jnp.float32)                     # (TT, C)
        acc = contrib if acc is None else acc + contrib

    x1 = x + acc + bproj_ref[0]                               # residual 1 (windowed order)

    # ---- norm2 + MLP + residual 2 -------------------------------------------
    xn2 = _layernorm(x1, g2_ref[0], b2_ref[0])
    hdn = jnp.dot(xn2.astype(MXU_DTYPE), w1_ref[...],
                  preferred_element_type=jnp.float32) + bb1_ref[0]
    # tanh GELU (EUP path); nn.GELU() is the exact erf form — deviation ~1e-3.
    hdn = jax.nn.gelu(hdn, approximate=True)
    y = jnp.dot(hdn.astype(MXU_DTYPE), w2_ref[...],
                preferred_element_type=jnp.float32) + bb2_ref[0]
    o_ref[0] = (x1 + y).reshape(WPT, N, C).astype(o_ref.dtype)


# ------------------------------ pallas_call wrapper --------------------------
def swin_block_pallas(xw, shift_mask, rel_bias, p):
    """xw: (B, NW, N, C) shifted+windowed tokens; returns the full block output in the
    same windowed order."""
    tok_spec = pl.BlockSpec((1, WPT, N, C), lambda b, j: (b, j, 0, 0))
    # TODO(synk): at real Swin stages with C < 128 make the output slab lane-dense
    # (more windows/images per step) to avoid masked vst.msk stores on v5e.
    return pl.pallas_call(
        swin_block_kernel,
        out_shape=jax.ShapeDtypeStruct(xw.shape, xw.dtype),
        grid=(xw.shape[0], NW // WPT),
        in_specs=[
            tok_spec,                                                 # tokens (pipelined)
            pl.BlockSpec((WPT, N, N), lambda b, j: (j, 0, 0)),        # shift-mask tile
            _const_spec((NUM_HEADS, N, N)),                           # rel-pos bias (resident)
            _const_spec((1, C)), _const_spec((1, C)),                 # ln1 gamma / beta
            _const_spec((C, 3 * C)), _const_spec((1, 3 * C)),         # W_qkv / b_qkv
            _const_spec((NUM_HEADS, DH, C)), _const_spec((1, C)),     # W_proj / b_proj
            _const_spec((1, C)), _const_spec((1, C)),                 # ln2 gamma / beta
            _const_spec((C, MLP_HIDDEN)), _const_spec((1, MLP_HIDDEN)),  # fc1
            _const_spec((MLP_HIDDEN, C)), _const_spec((1, C)),        # fc2
        ],
        out_specs=tok_spec,
        compiler_params=pltpu.CompilerParams(
            dimension_semantics=("parallel", "parallel"),
            vmem_limit_bytes=32 * 1024 * 1024),                       # raise v5e 16 MiB default
    )(xw, shift_mask, rel_bias,
      p["ln1_g"].reshape(1, C), p["ln1_b"].reshape(1, C),
      p["wqkv_mxu"], p["bqkv"].reshape(1, 3 * C),
      p["wproj_mxu"], p["bproj"].reshape(1, C),
      p["ln2_g"].reshape(1, C), p["ln2_b"].reshape(1, C),
      p["w1_mxu"], p["b1"].reshape(1, MLP_HIDDEN),
      p["w2_mxu"], p["b2"].reshape(1, C))


# ------------------------------ JAX glue ------------------------------------
def relative_position_index(ws):
    coords = np.stack(np.meshgrid(np.arange(ws), np.arange(ws), indexing="ij"))
    cf = coords.reshape(2, -1)
    rel = (cf[:, :, None] - cf[:, None, :]).transpose(1, 2, 0).astype(np.int64)
    rel[:, :, 0] += ws - 1
    rel[:, :, 1] += ws - 1
    rel[:, :, 0] *= 2 * ws - 1
    return rel.sum(-1)                                        # (N, N)


def compute_shift_mask(Hp, Wp, ws, ss):
    """Attention mask for SW-MSA (same as the Swin BasicLayer mask_matrix): (nW, N, N)."""
    img = np.zeros((Hp, Wp), np.float32)
    sl = (slice(0, -ws), slice(-ws, -ss), slice(-ss, None))
    cnt = 0
    for hs in sl:
        for wsl in sl:
            img[hs, wsl] = cnt
            cnt += 1
    mw = img.reshape(Hp // ws, ws, Wp // ws, ws).transpose(0, 2, 1, 3).reshape(-1, ws * ws)
    am = mw[:, None, :] - mw[:, :, None]
    return jnp.asarray(np.where(am != 0, -100.0, 0.0).astype(np.float32))


@jax.jit
def swin_block_forward(x, shift_mask, params):
    Bb, L, Cc = x.shape
    assert L == H * W
    # H, W are multiples of WS so no padding is required.
    # TODO(synk): the reference pads AFTER norm1 for resolutions not divisible by WS; that
    # padding path is not implemented because norm1 is fused into the attention kernel.

    # Per-head relative-position bias (heads, N, N) — plain-JAX gather, tiny.
    rel = params["rel_table"][params["rel_index"].reshape(-1)]
    rel = rel.reshape(N, N, NUM_HEADS).transpose(2, 0, 1).astype(jnp.float32)

    p = dict(params)
    p["wqkv_mxu"] = params["wqkv"].astype(MXU_DTYPE)
    p["wproj_mxu"] = params["wproj"].reshape(NUM_HEADS, DH, C).astype(MXU_DTYPE)
    p["w1_mxu"] = params["w1"].astype(MXU_DTYPE)
    p["w2_mxu"] = params["w2"].astype(MXU_DTYPE)

    # cyclic shift + window partition (cheap permutations stay in plain JAX)
    xs = x.reshape(Bb, H, W, Cc)
    if SHIFT > 0:
        xs = jnp.roll(xs, shift=(-SHIFT, -SHIFT), axis=(1, 2))
    xw = (xs.reshape(Bb, NWH, WS, NWW, WS, Cc)
            .transpose(0, 1, 3, 2, 4, 5)
            .reshape(Bb, NW, N, Cc))

    # fused norm1 + W-MSA/SW-MSA + residual1 + norm2 + MLP + residual2, in windowed order
    yw = swin_block_pallas(xw, shift_mask, rel, p)

    # window reverse + roll back (applied once, at the end)
    ys = (yw.reshape(Bb, NWH, NWW, WS, WS, Cc)
            .transpose(0, 1, 3, 2, 4, 5)
            .reshape(Bb, H, W, Cc))
    if SHIFT > 0:
        ys = jnp.roll(ys, shift=(SHIFT, SHIFT), axis=(1, 2))
    return ys.reshape(Bb, L, Cc)


# ------------------------------ plain-JAX reference --------------------------
def reference_forward(x, mask, params):
    Bb, L, Cc = x.shape
    shortcut = x
    xn = _layernorm(x, params["ln1_g"], params["ln1_b"]).reshape(Bb, H, W, Cc)
    if SHIFT > 0:
        xn = jnp.roll(xn, shift=(-SHIFT, -SHIFT), axis=(1, 2))
    xw = (xn.reshape(Bb, NWH, WS, NWW, WS, Cc)
            .transpose(0, 1, 3, 2, 4, 5)
            .reshape(Bb * NW, N, Cc))
    B_ = xw.shape[0]
    qkv = (xw @ params["wqkv"] + params["bqkv"]).reshape(B_, N, 3, NUM_HEADS, DH)
    qkv = qkv.transpose(2, 0, 3, 1, 4)                        # (3, B_, h, N, DH)
    q, k, v = qkv[0] * SCALE, qkv[1], qkv[2]
    attn = jnp.einsum("bhnd,bhmd->bhnm", q, k)
    rel = params["rel_table"][params["rel_index"].reshape(-1)].reshape(N, N, NUM_HEADS)
    attn = attn + rel.transpose(2, 0, 1)[None]
    if SHIFT > 0:
        attn = attn.reshape(Bb, NW, NUM_HEADS, N, N) + mask[None, :, None]
        attn = attn.reshape(B_, NUM_HEADS, N, N)
    attn = jax.nn.softmax(attn, axis=-1)
    out = jnp.einsum("bhnm,bhmd->bhnd", attn, v).transpose(0, 2, 1, 3).reshape(B_, N, Cc)
    out = out @ params["wproj"] + params["bproj"]
    out = (out.reshape(Bb, NWH, NWW, WS, WS, Cc)
              .transpose(0, 1, 3, 2, 4, 5)
              .reshape(Bb, H, W, Cc))
    if SHIFT > 0:
        out = jnp.roll(out, shift=(SHIFT, SHIFT), axis=(1, 2))
    x1 = shortcut + out.reshape(Bb, L, Cc)
    xn2 = _layernorm(x1, params["ln2_g"], params["ln2_b"])
    hdn = jax.nn.gelu(xn2 @ params["w1"] + params["b1"], approximate=False)
    return x1 + hdn @ params["w2"] + params["b2"]


# ------------------------------ parameters ----------------------------------
def init_params(key):
    ks = jax.random.split(key, 10)
    num_rel = (2 * WS - 1) * (2 * WS - 1)
    return {
        "ln1_g": jnp.ones((C,), DTYPE),
        "ln1_b": jnp.zeros((C,), DTYPE),
        "wqkv": 0.05 * jax.random.normal(ks[0], (C, 3 * C), DTYPE),
        "bqkv": 0.05 * jax.random.normal(ks[1], (3 * C,), DTYPE),
        "wproj": 0.05 * jax.random.normal(ks[2], (C, C), DTYPE),
        "bproj": 0.05 * jax.random.normal(ks[3], (C,), DTYPE),
        "rel_table": 0.02 * jax.random.normal(ks[4], (num_rel, NUM_HEADS), DTYPE),
        "rel_index": jnp.asarray(relative_position_index(WS), dtype=jnp.int32),
        "ln2_g": jnp.ones((C,), DTYPE),
        "ln2_b": jnp.zeros((C,), DTYPE),
        "w1": 0.05 * jax.random.normal(ks[5], (C, MLP_HIDDEN), DTYPE),
        "b1": 0.05 * jax.random.normal(ks[6], (MLP_HIDDEN,), DTYPE),
        "w2": 0.05 * jax.random.normal(ks[7], (MLP_HIDDEN, C), DTYPE),
        "b2": 0.05 * jax.random.normal(ks[8], (C,), DTYPE),
    }


# ------------------------------ main -----------------------------------------
if __name__ == "__main__":
    key = jax.random.PRNGKey(0)
    kx, kp = jax.random.split(key)

    params = init_params(kp)
    x = jax.random.normal(kx, (B, H * W, C), DTYPE)

    if SHIFT > 0:
        mask_matrix = compute_shift_mask(H, W, WS, SHIFT)          # (nW, N, N)
    else:
        mask_matrix = jnp.zeros((NW, N, N), jnp.float32)

    out = swin_block_forward(x, mask_matrix, params)
    out = jax.block_until_ready(out)
    assert out.shape == (B, H * W, C)
    assert bool(jnp.all(jnp.isfinite(out)))

    ref = reference_forward(x, mask_matrix if SHIFT > 0 else None, params)
    err = float(jnp.max(jnp.abs(out - ref)))
    assert err < 2e-2, f"mismatch vs plain-JAX reference: {err}"
    print("KERNEL_OK")
</pallas_src>

<mosaic_0001>
module attributes {stable_mosaic.version = 11 : i64} {
  func.func @swin_block_kernel(%arg0: i32, %arg1: i32, %arg2: memref<1x2x16x32xf32, #tpu.memory_space<vmem>>, %arg3: memref<2x16x16xf32, #tpu.memory_space<vmem>>, %arg4: memref<4x16x16xf32, #tpu.memory_space<vmem>>, %arg5: memref<1x32xf32, #tpu.memory_space<vmem>>, %arg6: memref<1x32xf32, #tpu.memory_space<vmem>>, %arg7: memref<32x96xbf16, #tpu.memory_space<vmem>>, %arg8: memref<1x96xf32, #tpu.memory_space<vmem>>, %arg9: memref<4x8x32xbf16, #tpu.memory_space<vmem>>, %arg10: memref<1x32xf32, #tpu.memory_space<vmem>>, %arg11: memref<1x32xf32, #tpu.memory_space<vmem>>, %arg12: memref<1x32xf32, #tpu.memory_space<vmem>>, %arg13: memref<32x128xbf16, #tpu.memory_space<vmem>>, %arg14: memref<1x128xf32, #tpu.memory_space<vmem>>, %arg15: memref<128x32xbf16, #tpu.memory_space<vmem>>, %arg16: memref<1x32xf32, #tpu.memory_space<vmem>>, %arg17: memref<1x2x16x32xf32, #tpu.memory_space<vmem>>) attributes {dimension_semantics = [#tpu.dimension_semantics<parallel>, #tpu.dimension_semantics<parallel>], iteration_bounds = array<i64: 2, 2>, scalar_prefetch = 0 : i64, scratch_operands = 0 : i64, tpu.core_type = #tpu.core_type<tc>, window_params = [{transform_indices = @transform_0, window_bounds = array<i64: 1, 2, 16, 32>}, {transform_indices = @transform_1, window_bounds = array<i64: 2, 16, 16>}, {pipeline_mode = #tpu.pipeline_mode<synchronous>, transform_indices = @transform_2, window_bounds = array<i64: 4, 16, 16>}, {pipeline_mode = #tpu.pipeline_mode<synchronous>, transform_indices = @transform_3, window_bounds = array<i64: 1, 32>}, {pipeline_mode = #tpu.pipeline_mode<synchronous>, transform_indices = @transform_4, window_bounds = array<i64: 1, 32>}, {pipeline_mode = #tpu.pipeline_mode<synchronous>, transform_indices = @transform_5, window_bounds = array<i64: 32, 96>}, {pipeline_mode = #tpu.pipeline_mode<synchronous>, transform_indices = @transform_6, window_bounds = array<i64: 1, 96>}, {pipeline_mode = #tpu.pipeline_mode<synchronous>, transform_indices = @transform_7, window_bounds = array<i64: 4, 8, 32>}, {pipeline_mode = #tpu.pipeline_mode<synchronous>, transform_indices = @transform_8, window_bounds = array<i64: 1, 32>}, {pipeline_mode = #tpu.pipeline_mode<synchronous>, transform_indices = @transform_9, window_bounds = array<i64: 1, 32>}, {pipeline_mode = #tpu.pipeline_mode<synchronous>, transform_indices = @transform_10, window_bounds = array<i64: 1, 32>}, {pipeline_mode = #tpu.pipeline_mode<synchronous>, transform_indices = @transform_11, window_bounds = array<i64: 32, 128>}, {pipeline_mode = #tpu.pipeline_mode<synchronous>, transform_indices = @transform_12, window_bounds = array<i64: 1, 128>}, {pipeline_mode = #tpu.pipeline_mode<synchronous>, transform_indices = @transform_13, window_bounds = array<i64: 128, 32>}, {pipeline_mode = #tpu.pipeline_mode<synchronous>, transform_indices = @transform_14, window_bounds = array<i64: 1, 32>}, {transform_indices = @transform_15, window_bounds = array<i64: 1, 2, 16, 32>}]} {
    %c0 = arith.constant 0 : index
    %c0_0 = arith.constant 0 : index
    %c0_1 = arith.constant 0 : index
    %c0_2 = arith.constant 0 : index
    %0 = vector.load %arg2[%c0, %c0_0, %c0_1, %c0_2] : memref<1x2x16x32xf32, #tpu.memory_space<vmem>>, vector<1x2x16x32xf32>
    %1 = vector.shape_cast %0 : vector<1x2x16x32xf32> to vector<2x16x32xf32>
    %2 = vector.shape_cast %1 : vector<2x16x32xf32> to vector<32x32xf32>
    %c0_3 = arith.constant 0 : index
    %c0_4 = arith.constant 0 : index
    %3 = vector.load %arg5[%c0_3, %c0_4] : memref<1x32xf32, #tpu.memory_space<vmem>>, vector<1x32xf32>
    %4 = vector.shape_cast %3 : vector<1x32xf32> to vector<32xf32>
    %c0_5 = arith.constant 0 : index
    %c0_6 = arith.constant 0 : index
    %5 = vector.load %arg6[%c0_5, %c0_6] : memref<1x32xf32, #tpu.memory_space<vmem>>, vector<1x32xf32>
    %6 = vector.shape_cast %5 : vector<1x32xf32> to vector<32xf32>
    %cst = arith.constant dense<0.000000e+00> : vector<32xf32>
    %7 = vector.multi_reduction <add>, %2, %cst [1] : vector<32x32xf32> to vector<32xf32>
    %8 = vector.shape_cast %7 : vector<32xf32> to vector<32x1xf32>
    %cst_7 = arith.constant 3.200000e+01 : f32
    %9 = vector.broadcast %cst_7 : f32 to vector<32x1xf32>
    %10 = arith.divf %8, %9 : vector<32x1xf32>
    %11 = vector.broadcast %10 : vector<32x1xf32> to vector<32x32xf32>
    %12 = arith.subf %2, %11 : vector<32x32xf32>
    %13 = arith.mulf %12, %12 : vector<32x32xf32>
    %cst_8 = arith.constant dense<0.000000e+00> : vector<32xf32>
    %14 = vector.multi_reduction <add>, %13, %cst_8 [1] : vector<32x32xf32> to vector<32xf32>
    %15 = vector.shape_cast %14 : vector<32xf32> to vector<32x1xf32>
    %cst_9 = arith.constant 3.200000e+01 : f32
    %16 = vector.broadcast %cst_9 : f32 to vector<32x1xf32>
    %17 = arith.divf %15, %16 : vector<32x1xf32>
    %18 = vector.broadcast %10 : vector<32x1xf32> to vector<32x32xf32>
    %19 = arith.subf %2, %18 : vector<32x32xf32>
    %cst_10 = arith.constant 9.99999974E-6 : f32
    %20 = vector.broadcast %cst_10 : f32 to vector<32x1xf32>
    %21 = arith.addf %17, %20 : vector<32x1xf32>
    %22 = math.rsqrt %21 : vector<32x1xf32>
    %23 = vector.broadcast %22 : vector<32x1xf32> to vector<32x32xf32>
    %24 = arith.mulf %19, %23 : vector<32x32xf32>
    %25 = vector.shape_cast %4 : vector<32xf32> to vector<1x32xf32>
    %26 = vector.broadcast %25 : vector<1x32xf32> to vector<32x32xf32>
    %27 = arith.mulf %24, %26 : vector<32x32xf32>
    %28 = vector.shape_cast %6 : vector<32xf32> to vector<1x32xf32>
    %29 = vector.broadcast %28 : vector<1x32xf32> to vector<32x32xf32>
    %30 = arith.addf %27, %29 : vector<32x32xf32>
    %31 = arith.truncf %30 : vector<32x32xf32> to vector<32x32xbf16>
    %c0_11 = arith.constant 0 : index
    %c0_12 = arith.constant 0 : index
    %32 = vector.load %arg7[%c0_11, %c0_12] : memref<32x96xbf16, #tpu.memory_space<vmem>>, vector<32x96xbf16>
    %cst_13 = arith.constant dense<0.000000e+00> : vector<32x96xf32>
    %33 = tpu.matmul %31, %32, %cst_13 {dimension_numbers = #tpu.dot_dimension_numbers<[1], [0], [0], [1], [0, 0, 1, 1], [], []>} : vector<32x32xbf16>, vector<32x96xbf16>, vector<32x96xf32> -> vector<32x96xf32>
    %c0_14 = arith.constant 0 : index
    %c0_15 = arith.constant 0 : index
    %34 = vector.load %arg8[%c0_14, %c0_15] : memref<1x96xf32, #tpu.memory_space<vmem>>, vector<1x96xf32>
    %35 = vector.shape_cast %34 : vector<1x96xf32> to vector<96xf32>
    %36 = vector.shape_cast %35 : vector<96xf32> to vector<1x96xf32>
    %37 = vector.broadcast %36 : vector<1x96xf32> to vector<32x96xf32>
    %38 = arith.addf %33, %37 : vector<32x96xf32>
    %39 = vector.shape_cast %38 : vector<32x96xf32> to vector<2x16x96xf32>
    %c0_16 = arith.constant 0 : index
    %c0_17 = arith.constant 0 : index
    %c0_18 = arith.constant 0 : index
    %40 = vector.load %arg3[%c0_16, %c0_17, %c0_18] : memref<2x16x16xf32, #tpu.memory_space<vmem>>, vector<2x16x16xf32>
    %c0_19 = arith.constant 0 : index
    %c0_20 = arith.constant 0 : index
    %c0_21 = arith.constant 0 : index
    %41 = vector.load %arg4[%c0_19, %c0_20, %c0_21] : memref<4x16x16xf32, #tpu.memory_space<vmem>>, vector<4x16x16xf32>
    %c0_22 = arith.constant 0 : index
    %c0_23 = arith.constant 0 : index
    %c0_24 = arith.constant 0 : index
    %42 = vector.load %arg9[%c0_22, %c0_23, %c0_24] : memref<4x8x32xbf16, #tpu.memory_space<vmem>>, vector<4x8x32xbf16>
    %43 = vector.extract_strided_slice %39 {offsets = [0, 0, 0], sizes = [2, 16, 8], strides = [1, 1, 1]} : vector<2x16x96xf32> to vector<2x16x8xf32>
    %cst_25 = arith.constant 0.353553385 : f32
    %44 = vector.broadcast %cst_25 : f32 to vector<2x16x8xf32>
    %45 = arith.mulf %43, %44 : vector<2x16x8xf32>
    %46 = arith.truncf %45 : vector<2x16x8xf32> to vector<2x16x8xbf16>
    %47 = vector.extract_strided_slice %39 {offsets = [0, 0, 32], sizes = [2, 16, 8], strides = [1, 1, 1]} : vector<2x16x96xf32> to vector<2x16x8xf32>
    %48 = arith.truncf %47 : vector<2x16x8xf32> to vector<2x16x8xbf16>
    %49 = vector.extract_strided_slice %39 {offsets = [0, 0, 64], sizes = [2, 16, 8], strides = [1, 1, 1]} : vector<2x16x96xf32> to vector<2x16x8xf32>
    %50 = arith.truncf %49 : vector<2x16x8xf32> to vector<2x16x8xbf16>
    "tpu.trace_start"() <{level = 10 : i32, message = "wnd,wmd->wnm"}> : () -> ()
    %cst_26 = arith.constant dense<0.000000e+00> : vector<2x16x16xf32>
    %51 = tpu.matmul %46, %48, %cst_26 {dimension_numbers = #tpu.dot_dimension_numbers<[2], [2], [1], [1], [0, 0, 0, 1, 1, 1], [0], [0]>} : vector<2x16x8xbf16>, vector<2x16x8xbf16>, vector<2x16x16xf32> -> vector<2x16x16xf32>
    "tpu.trace_stop"() : () -> ()
    %52 = vector.extract_strided_slice %41 {offsets = [0, 0, 0], sizes = [1, 16, 16], strides = [1, 1, 1]} : vector<4x16x16xf32> to vector<1x16x16xf32>
    %53 = vector.shape_cast %52 : vector<1x16x16xf32> to vector<16x16xf32>
    %54 = vector.shape_cast %53 : vector<16x16xf32> to vector<1x16x16xf32>
    %55 = vector.broadcast %54 : vector<1x16x16xf32> to vector<2x16x16xf32>
    %56 = arith.addf %51, %55 : vector<2x16x16xf32>
    %57 = arith.addf %56, %40 : vector<2x16x16xf32>
    %cst_27 = arith.constant dense<0xFF800000> : vector<2x16xf32>
    %58 = vector.multi_reduction <maximumf>, %57, %cst_27 [2] : vector<2x16x16xf32> to vector<2x16xf32>
    %59 = vector.shape_cast %58 : vector<2x16xf32> to vector<2x16x1xf32>
    %60 = vector.broadcast %59 : vector<2x16x1xf32> to vector<2x16x16xf32>
    %61 = arith.subf %57, %60 : vector<2x16x16xf32>
    %62 = math.exp %61 : vector<2x16x16xf32>
    %cst_28 = arith.constant dense<0.000000e+00> : vector<2x16xf32>
    %63 = vector.multi_reduction <add>, %62, %cst_28 [2] : vector<2x16x16xf32> to vector<2x16xf32>
    %64 = vector.shape_cast %63 : vector<2x16xf32> to vector<2x16x1xf32>
    %65 = tpu.reciprocal %64 {approx = true} : vector<2x16x1xf32> -> vector<2x16x1xf32>
    %66 = vector.broadcast %65 : vector<2x16x1xf32> to vector<2x16x16xf32>
    %67 = arith.mulf %62, %66 : vector<2x16x16xf32>
    %68 = arith.truncf %67 : vector<2x16x16xf32> to vector<2x16x16xbf16>
    "tpu.trace_start"() <{level = 10 : i32, message = "wnm,wmd->wnd"}> : () -> ()
    %cst_29 = arith.constant dense<0.000000e+00> : vector<2x16x8xf32>
    %69 = tpu.matmul %68, %50, %cst_29 {dimension_numbers = #tpu.dot_dimension_numbers<[2], [1], [1], [2], [0, 0, 0, 1, 1, 2], [0], [0]>} : vector<2x16x16xbf16>, vector<2x16x8xbf16>, vector<2x16x8xf32> -> vector<2x16x8xf32>
    "tpu.trace_stop"() : () -> ()
    %70 = vector.shape_cast %69 : vector<2x16x8xf32> to vector<32x8xf32>
    %71 = arith.truncf %70 : vector<32x8xf32> to vector<32x8xbf16>
    %72 = vector.extract_strided_slice %42 {offsets = [0, 0, 0], sizes = [1, 8, 32], strides = [1, 1, 1]} : vector<4x8x32xbf16> to vector<1x8x32xbf16>
    %73 = vector.shape_cast %72 : vector<1x8x32xbf16> to vector<8x32xbf16>
    %cst_30 = arith.constant dense<0.000000e+00> : vector<32x32xf32>
    %74 = tpu.matmul %71, %73, %cst_30 {dimension_numbers = #tpu.dot_dimension_numbers<[1], [0], [0], [1], [0, 0, 1, 1], [], []>} : vector<32x8xbf16>, vector<8x32xbf16>, vector<32x32xf32> -> vector<32x32xf32>
    %75 = vector.extract_strided_slice %39 {offsets = [0, 0, 8], sizes = [2, 16, 8], strides = [1, 1, 1]} : vector<2x16x96xf32> to vector<2x16x8xf32>
    %cst_31 = arith.constant 0.353553385 : f32
    %76 = vector.broadcast %cst_31 : f32 to vector<2x16x8xf32>
    %77 = arith.mulf %75, %76 : vector<2x16x8xf32>
    %78 = arith.truncf %77 : vector<2x16x8xf32> to vector<2x16x8xbf16>
    %79 = vector.extract_strided_slice %39 {offsets = [0, 0, 40], sizes = [2, 16, 8], strides = [1, 1, 1]} : vector<2x16x96xf32> to vector<2x16x8xf32>
    %80 = arith.truncf %79 : vector<2x16x8xf32> to vector<2x16x8xbf16>
    %81 = vector.extract_strided_slice %39 {offsets = [0, 0, 72], sizes = [2, 16, 8], strides = [1, 1, 1]} : vector<2x16x96xf32> to vector<2x16x8xf32>
    %82 = arith.truncf %81 : vector<2x16x8xf32> to vector<2x16x8xbf16>
    "tpu.trace_start"() <{level = 10 : i32, message = "wnd,wmd->wnm"}> : () -> ()
    %cst_32 = arith.constant dense<0.000000e+00> : vector<2x16x16xf32>
    %83 = tpu.matmul %78, %80, %cst_32 {dimension_numbers = #tpu.dot_dimension_numbers<[2], [2], [1], [1], [0, 0, 0, 1, 1, 1], [0], [0]>} : vector<2x16x8xbf16>, vector<2x16x8xbf16>, vector<2x16x16xf32> -> vector<2x16x16xf32>
    "tpu.trace_stop"() : () -> ()
    %84 = vector.extract_strided_slice %41 {offsets = [1, 0, 0], sizes = [1, 16, 16], strides = [1, 1, 1]} : vector<4x16x16xf32> to vector<1x16x16xf32>
    %85 = vector.shape_cast %84 : vector<1x16x16xf32> to vector<16x16xf32>
    %86 = vector.shape_cast %85 : vector<16x16xf32> to vector<1x16x16xf32>
    %87 = vector.broadcast %86 : vector<1x16x16xf32> to vector<2x16x16xf32>
    %88 = arith.addf %83, %87 : vector<2x16x16xf32>
    %89 = arith.addf %88, %40 : vector<2x16x16xf32>
    %cst_33 = arith.constant dense<0xFF800000> : vector<2x16xf32>
    %90 = vector.multi_reduction <maximumf>, %89, %cst_33 [2] : vector<2x16x16xf32> to vector<2x16xf32>
    %91 = vector.shape_cast %90 : vector<2x16xf32> to vector<2x16x1xf32>
    %92 = vector.broadcast %91 : vector<2x16x1xf32> to vector<2x16x16xf32>
    %93 = arith.subf %89, %92 : vector<2x16x16xf32>
    %94 = math.exp %93 : vector<2x16x16xf32>
    %cst_34 = arith.constant dense<0.000000e+00> : vector<2x16xf32>
    %95 = vector.multi_reduction <add>, %94, %cst_34 [2] : vector<2x16x16xf32> to vector<2x16xf32>
    %96 = vector.shape_cast %95 : vector<2x16xf32> to vector<2x16x1xf32>
    %97 = tpu.reciprocal %96 {approx = true} : vector<2x16x1xf32> -> vector<2x16x1xf32>
    %98 = vector.broadcast %97 : vector<2x16x1xf32> to vector<2x16x16xf32>
    %99 = arith.mulf %94, %98 : vector<2x16x16xf32>
    %100 = arith.truncf %99 : vector<2x16x16xf32> to vector<2x16x16xbf16>
    "tpu.trace_start"() <{level = 10 : i32, message = "wnm,wmd->wnd"}> : () -> ()
    %cst_35 = arith.constant dense<0.000000e+00> : vector<2x16x8xf32>
    %101 = tpu.matmul %100, %82, %cst_35 {dimension_numbers = #tpu.dot_dimension_numbers<[2], [1], [1], [2], [0, 0, 0, 1, 1, 2], [0], [0]>} : vector<2x16x16xbf16>, vector<2x16x8xbf16>, vector<2x16x8xf32> -> vector<2x16x8xf32>
    "tpu.trace_stop"() : () -> ()
    %102 = vector.shape_cast %101 : vector<2x16x8xf32> to vector<32x8xf32>
    %103 = arith.truncf %102 : vector<32x8xf32> to vector<32x8xbf16>
    %104 = vector.extract_strided_slice %42 {offsets = [1, 0, 0], sizes = [1, 8, 32], strides = [1, 1, 1]} : vector<4x8x32xbf16> to vector<1x8x32xbf16>
    %105 = vector.shape_cast %104 : vector<1x8x32xbf16> to vector<8x32xbf16>
    %cst_36 = arith.constant dense<0.000000e+00> : vector<32x32xf32>
    %106 = tpu.matmul %103, %105, %cst_36 {dimension_numbers = #tpu.dot_dimension_numbers<[1], [0], [0], [1], [0, 0, 1, 1], [], []>} : vector<32x8xbf16>, vector<8x32xbf16>, vector<32x32xf32> -> vector<32x32xf32>
    %107 = arith.addf %74, %106 : vector<32x32xf32>
    %108 = vector.extract_strided_slice %39 {offsets = [0, 0, 16], sizes = [2, 16, 8], strides = [1, 1, 1]} : vector<2x16x96xf32> to vector<2x16x8xf32>
    %cst_37 = arith.constant 0.353553385 : f32
    %109 = vector.broadcast %cst_37 : f32 to vector<2x16x8xf32>
    %110 = arith.mulf %108, %109 : vector<2x16x8xf32>
    %111 = arith.truncf %110 : vector<2x16x8xf32> to vector<2x16x8xbf16>
    %112 = vector.extract_strided_slice %39 {offsets = [0, 0, 48], sizes = [2, 16, 8], strides = [1, 1, 1]} : vector<2x16x96xf32> to vector<2x16x8xf32>
    %113 = arith.truncf %112 : vector<2x16x8xf32> to vector<2x16x8xbf16>
    %114 = vector.extract_strided_slice %39 {offsets = [0, 0, 80], sizes = [2, 16, 8], strides = [1, 1, 1]} : vector<2x16x96xf32> to vector<2x16x8xf32>
    %115 = arith.truncf %114 : vector<2x16x8xf32> to vector<2x16x8xbf16>
    "tpu.trace_start"() <{level = 10 : i32, message = "wnd,wmd->wnm"}> : () -> ()
    %cst_38 = arith.constant dense<0.000000e+00> : vector<2x16x16xf32>
    %116 = tpu.matmul %111, %113, %cst_38 {dimension_numbers = #tpu.dot_dimension_numbers<[2], [2], [1], [1], [0, 0, 0, 1, 1, 1], [0], [0]>} : vector<2x16x8xbf16>, vector<2x16x8xbf16>, vector<2x16x16xf32> -> vector<2x16x16xf32>
    "tpu.trace_stop"() : () -> ()
    %117 = vector.extract_strided_slice %41 {offsets = [2, 0, 0], sizes = [1, 16, 16], strides = [1, 1, 1]} : vector<4x16x16xf32> to vector<1x16x16xf32>
    %118 = vector.shape_cast %117 : vector<1x16x16xf32> to vector<16x16xf32>
    %119 = vector.shape_cast %118 : vector<16x16xf32> to vector<1x16x16xf32>
    %120 = vector.broadcast %119 : vector<1x16x16xf32> to vector<2x16x16xf32>
    %121 = arith.addf %116, %120 : vector<2x16x16xf32>
    %122 = arith.addf %121, %40 : vector<2x16x16xf32>
    %cst_39 = arith.constant dense<0xFF800000> : vector<2x16xf32>
    %123 = vector.multi_reduction <maximumf>, %122, %cst_39 [2] : vector<2x16x16xf32> to vector<2x16xf32>
    %124 = vector.shape_cast %123 : vector<2x16xf32> to vector<2x16x1xf32>
    %125 = vector.broadcast %124 : vector<2x16x1xf32> to vector<2x16x16xf32>
    %126 = arith.subf %122, %125 : vector<2x16x16xf32>
    %127 = math.exp %126 : vector<2x16x16xf32>
    %cst_40 = arith.constant dense<0.000000e+00> : vector<2x16xf32>
    %128 = vector.multi_reduction <add>, %127, %cst_40 [2] : vector<2x16x16xf32> to vector<2x16xf32>
    %129 = vector.shape_cast %128 : vector<2x16xf32> to vector<2x16x1xf32>
    %130 = tpu.reciprocal %129 {approx = true} : vector<2x16x1xf32> -> vector<2x16x1xf32>
    %131 = vector.broadcast %130 : vector<2x16x1xf32> to vector<2x16x16xf32>
    %132 = arith.mulf %127, %131 : vector<2x16x16xf32>
    %133 = arith.truncf %132 : vector<2x16x16xf32> to vector<2x16x16xbf16>
    "tpu.trace_start"() <{level = 10 : i32, message = "wnm,wmd->wnd"}> : () -> ()
    %cst_41 = arith.constant dense<0.000000e+00> : vector<2x16x8xf32>
    %134 = tpu.matmul %133, %115, %cst_41 {dimension_numbers = #tpu.dot_dimension_numbers<[2], [1], [1], [2], [0, 0, 0, 1, 1, 2], [0], [0]>} : vector<2x16x16xbf16>, vector<2x16x8xbf16>, vector<2x16x8xf32> -> vector<2x16x8xf32>
    "tpu.trace_stop"() : () -> ()
    %135 = vector.shape_cast %134 : vector<2x16x8xf32> to vector<32x8xf32>
    %136 = arith.truncf %135 : vector<32x8xf32> to vector<32x8xbf16>
    %137 = vector.extract_strided_slice %42 {offsets = [2, 0, 0], sizes = [1, 8, 32], strides = [1, 1, 1]} : vector<4x8x32xbf16> to vector<1x8x32xbf16>
    %138 = vector.shape_cast %137 : vector<1x8x32xbf16> to vector<8x32xbf16>
    %cst_42 = arith.constant dense<0.000000e+00> : vector<32x32xf32>
    %139 = tpu.matmul %136, %138, %cst_42 {dimension_numbers = #tpu.dot_dimension_numbers<[1], [0], [0], [1], [0, 0, 1, 1], [], []>} : vector<32x8xbf16>, vector<8x32xbf16>, vector<32x32xf32> -> vector<32x32xf32>
    %140 = arith.addf %107, %139 : vector<32x32xf32>
    %141 = vector.extract_strided_slice %39 {offsets = [0, 0, 24], sizes = [2, 16, 8], strides = [1, 1, 1]} : vector<2x16x96xf32> to vector<2x16x8xf32>
    %cst_43 = arith.constant 0.353553385 : f32
    %142 = vector.broadcast %cst_43 : f32 to vector<2x16x8xf32>
    %143 = arith.mulf %141, %142 : vector<2x16x8xf32>
    %144 = arith.truncf %143 : vector<2x16x8xf32> to vector<2x16x8xbf16>
    %145 = vector.extract_strided_slice %39 {offsets = [0, 0, 56], sizes = [2, 16, 8], strides = [1, 1, 1]} : vector<2x16x96xf32> to vector<2x16x8xf32>
    %146 = arith.truncf %145 : vector<2x16x8xf32> to vector<2x16x8xbf16>
    %147 = vector.extract_strided_slice %39 {offsets = [0, 0, 88], sizes = [2, 16, 8], strides = [1, 1, 1]} : vector<2x16x96xf32> to vector<2x16x8xf32>
    %148 = arith.truncf %147 : vector<2x16x8xf32> to vector<2x16x8xbf16>
    "tpu.trace_start"() <{level = 10 : i32, message = "wnd,wmd->wnm"}> : () -> ()
    %cst_44 = arith.constant dense<0.000000e+00> : vector<2x16x16xf32>
    %149 = tpu.matmul %144, %146, %cst_44 {dimension_numbers = #tpu.dot_dimension_numbers<[2], [2], [1], [1], [0, 0, 0, 1, 1, 1], [0], [0]>} : vector<2x16x8xbf16>, vector<2x16x8xbf16>, vector<2x16x16xf32> -> vector<2x16x16xf32>
    "tpu.trace_stop"() : () -> ()
    %150 = vector.extract_strided_slice %41 {offsets = [3, 0, 0], sizes = [1, 16, 16], strides = [1, 1, 1]} : vector<4x16x16xf32> to vector<1x16x16xf32>
    %151 = vector.shape_cast %150 : vector<1x16x16xf32> to vector<16x16xf32>
    %152 = vector.shape_cast %151 : vector<16x16xf32> to vector<1x16x16xf32>
    %153 = vector.broadcast %152 : vector<1x16x16xf32> to vector<2x16x16xf32>
    %154 = arith.addf %149, %153 : vector<2x16x16xf32>
    %155 = arith.addf %154, %40 : vector<2x16x16xf32>
    %cst_45 = arith.constant dense<0xFF800000> : vector<2x16xf32>
    %156 = vector.multi_reduction <maximumf>, %155, %cst_45 [2] : vector<2x16x16xf32> to vector<2x16xf32>
    %157 = vector.shape_cast %156 : vector<2x16xf32> to vector<2x16x1xf32>
    %158 = vector.broadcast %157 : vector<2x16x1xf32> to vector<2x16x16xf32>
    %159 = arith.subf %155, %158 : vector<2x16x16xf32>
    %160 = math.exp %159 : vector<2x16x16xf32>
    %cst_46 = arith.constant dense<0.000000e+00> : vector<2x16xf32>
    %161 = vector.multi_reduction <add>, %160, %cst_46 [2] : vector<2x16x16xf32> to vector<2x16xf32>
    %162 = vector.shape_cast %161 : vector<2x16xf32> to vector<2x16x1xf32>
    %163 = tpu.reciprocal %162 {approx = true} : vector<2x16x1xf32> -> vector<2x16x1xf32>
    %164 = vector.broadcast %163 : vector<2x16x1xf32> to vector<2x16x16xf32>
    %165 = arith.mulf %160, %164 : vector<2x16x16xf32>
    %166 = arith.truncf %165 : vector<2x16x16xf32> to vector<2x16x16xbf16>
    "tpu.trace_start"() <{level = 10 : i32, message = "wnm,wmd->wnd"}> : () -> ()
    %cst_47 = arith.constant dense<0.000000e+00> : vector<2x16x8xf32>
    %167 = tpu.matmul %166, %148, %cst_47 {dimension_numbers = #tpu.dot_dimension_numbers<[2], [1], [1], [2], [0, 0, 0, 1, 1, 2], [0], [0]>} : vector<2x16x16xbf16>, vector<2x16x8xbf16>, vector<2x16x8xf32> -> vector<2x16x8xf32>
    "tpu.trace_stop"() : () -> ()
    %168 = vector.shape_cast %167 : vector<2x16x8xf32> to vector<32x8xf32>
    %169 = arith.truncf %168 : vector<32x8xf32> to vector<32x8xbf16>
    %170 = vector.extract_strided_slice %42 {offsets = [3, 0, 0], sizes = [1, 8, 32], strides = [1, 1, 1]} : vector<4x8x32xbf16> to vector<1x8x32xbf16>
    %171 = vector.shape_cast %170 : vector<1x8x32xbf16> to vector<8x32xbf16>
    %cst_48 = arith.constant dense<0.000000e+00> : vector<32x32xf32>
    %172 = tpu.matmul %169, %171, %cst_48 {dimension_numbers = #tpu.dot_dimension_numbers<[1], [0], [0], [1], [0, 0, 1, 1], [], []>} : vector<32x8xbf16>, vector<8x32xbf16>, vector<32x32xf32> -> vector<32x32xf32>
    %173 = arith.addf %140, %172 : vector<32x32xf32>
    %174 = arith.addf %2, %173 : vector<32x32xf32>
    %c0_49 = arith.constant 0 : index
    %c0_50 = arith.constant 0 : index
    %175 = vector.load %arg10[%c0_49, %c0_50] : memref<1x32xf32, #tpu.memory_space<vmem>>, vector<1x32xf32>
    %176 = vector.shape_cast %175 : vector<1x32xf32> to vector<32xf32>
    %177 = vector.shape_cast %176 : vector<32xf32> to vector<1x32xf32>
    %178 = vector.broadcast %177 : vector<1x32xf32> to vector<32x32xf32>
    %179 = arith.addf %174, %178 : vector<32x32xf32>
    %c0_51 = arith.constant 0 : index
    %c0_52 = arith.constant 0 : index
    %180 = vector.load %arg11[%c0_51, %c0_52] : memref<1x32xf32, #tpu.memory_space<vmem>>, vector<1x32xf32>
    %181 = vector.shape_cast %180 : vector<1x32xf32> to vector<32xf32>
    %c0_53 = arith.constant 0 : index
    %c0_54 = arith.constant 0 : index
    %182 = vector.load %arg12[%c0_53, %c0_54] : memref<1x32xf32, #tpu.memory_space<vmem>>, vector<1x32xf32>
    %183 = vector.shape_cast %182 : vector<1x32xf32> to vector<32xf32>
    %cst_55 = arith.constant dense<0.000000e+00> : vector<32xf32>
    %184 = vector.multi_reduction <add>, %179, %cst_55 [1] : vector<32x32xf32> to vector<32xf32>
    %185 = vector.shape_cast %184 : vector<32xf32> to vector<32x1xf32>
    %cst_56 = arith.constant 3.200000e+01 : f32
    %186 = vector.broadcast %cst_56 : f32 to vector<32x1xf32>
    %187 = arith.divf %185, %186 : vector<32x1xf32>
    %188 = vector.broadcast %187 : vector<32x1xf32> to vector<32x32xf32>
    %189 = arith.subf %179, %188 : vector<32x32xf32>
    %190 = arith.mulf %189, %189 : vector<32x32xf32>
    %cst_57 = arith.constant dense<0.000000e+00> : vector<32xf32>
    %191 = vector.multi_reduction <add>, %190, %cst_57 [1] : vector<32x32xf32> to vector<32xf32>
    %192 = vector.shape_cast %191 : vector<32xf32> to vector<32x1xf32>
    %cst_58 = arith.constant 3.200000e+01 : f32
    %193 = vector.broadcast %cst_58 : f32 to vector<32x1xf32>
    %194 = arith.divf %192, %193 : vector<32x1xf32>
    %195 = vector.broadcast %187 : vector<32x1xf32> to vector<32x32xf32>
    %196 = arith.subf %179, %195 : vector<32x32xf32>
    %cst_59 = arith.constant 9.99999974E-6 : f32
    %197 = vector.broadcast %cst_59 : f32 to vector<32x1xf32>
    %198 = arith.addf %194, %197 : vector<32x1xf32>
    %199 = math.rsqrt %198 : vector<32x1xf32>
    %200 = vector.broadcast %199 : vector<32x1xf32> to vector<32x32xf32>
    %201 = arith.mulf %196, %200 : vector<32x32xf32>
    %202 = vector.shape_cast %181 : vector<32xf32> to vector<1x32xf32>
    %203 = vector.broadcast %202 : vector<1x32xf32> to vector<32x32xf32>
    %204 = arith.mulf %201, %203 : vector<32x32xf32>
    %205 = vector.shape_cast %183 : vector<32xf32> to vector<1x32xf32>
    %206 = vector.broadcast %205 : vector<1x32xf32> to vector<32x32xf32>
    %207 = arith.addf %204, %206 : vector<32x32xf32>
    %208 = arith.truncf %207 : vector<32x32xf32> to vector<32x32xbf16>
    %c0_60 = arith.constant 0 : index
    %c0_61 = arith.constant 0 : index
    %209 = vector.load %arg13[%c0_60, %c0_61] : memref<32x128xbf16, #tpu.memory_space<vmem>>, vector<32x128xbf16>
    %cst_62 = arith.constant dense<0.000000e+00> : vector<32x128xf32>
    %210 = tpu.matmul %208, %209, %cst_62 {dimension_numbers = #tpu.dot_dimension_numbers<[1], [0], [0], [1], [0, 0, 1, 1], [], []>} : vector<32x32xbf16>, vector<32x128xbf16>, vector<32x128xf32> -> vector<32x128xf32>
    %c0_63 = arith.constant 0 : index
    %c0_64 = arith.constant 0 : index
    %211 = vector.load %arg14[%c0_63, %c0_64] : memref<1x128xf32, #tpu.memory_space<vmem>>, vector<1x128xf32>
    %212 = vector.shape_cast %211 : vector<1x128xf32> to vector<128xf32>
    %213 = vector.shape_cast %212 : vector<128xf32> to vector<1x128xf32>
    %214 = vector.broadcast %213 : vector<1x128xf32> to vector<32x128xf32>
    %215 = arith.addf %210, %214 : vector<32x128xf32>
    %216 = arith.mulf %215, %215 : vector<32x128xf32>
    %217 = arith.mulf %215, %216 : vector<32x128xf32>
    %cst_65 = arith.constant 4.471500e-02 : f32
    %218 = vector.broadcast %cst_65 : f32 to vector<32x128xf32>
    %219 = arith.mulf %218, %217 : vector<32x128xf32>
    %220 = arith.addf %215, %219 : vector<32x128xf32>
    %cst_66 = arith.constant 0.797884583 : f32
    %221 = vector.broadcast %cst_66 : f32 to vector<32x128xf32>
    %222 = arith.mulf %221, %220 : vector<32x128xf32>
    %223 = math.tanh %222 : vector<32x128xf32>
    %cst_67 = arith.constant 1.000000e+00 : f32
    %224 = vector.broadcast %cst_67 : f32 to vector<32x128xf32>
    %225 = arith.addf %224, %223 : vector<32x128xf32>
    %cst_68 = arith.constant 5.000000e-01 : f32
    %226 = vector.broadcast %cst_68 : f32 to vector<32x128xf32>
    %227 = arith.mulf %226, %225 : vector<32x128xf32>
    %228 = arith.mulf %215, %227 : vector<32x128xf32>
    %229 = arith.truncf %228 : vector<32x128xf32> to vector<32x128xbf16>
    %c0_69 = arith.constant 0 : index
    %c0_70 = arith.constant 0 : index
    %230 = vector.load %arg15[%c0_69, %c0_70] : memref<128x32xbf16, #tpu.memory_space<vmem>>, vector<128x32xbf16>
    %cst_71 = arith.constant dense<0.000000e+00> : vector<32x32xf32>
    %231 = tpu.matmul %229, %230, %cst_71 {dimension_numbers = #tpu.dot_dimension_numbers<[1], [0], [0], [1], [0, 0, 1, 1], [], []>} : vector<32x128xbf16>, vector<128x32xbf16>, vector<32x32xf32> -> vector<32x32xf32>
    %c0_72 = arith.constant 0 : index
    %c0_73 = arith.constant 0 : index
    %232 = vector.load %arg16[%c0_72, %c0_73] : memref<1x32xf32, #tpu.memory_space<vmem>>, vector<1x32xf32>
    %233 = vector.shape_cast %232 : vector<1x32xf32> to vector<32xf32>
    %234 = vector.shape_cast %233 : vector<32xf32> to vector<1x32xf32>
    %235 = vector.broadcast %234 : vector<1x32xf32> to vector<32x32xf32>
    %236 = arith.addf %231, %235 : vector<32x32xf32>
    %237 = arith.addf %179, %236 : vector<32x32xf32>
    %238 = vector.shape_cast %237 : vector<32x32xf32> to vector<2x16x32xf32>
    %c0_74 = arith.constant 0 : index
    %c0_75 = arith.constant 0 : index
    %c0_76 = arith.constant 0 : index
    %c0_77 = arith.constant 0 : index
    %239 = vector.load %arg17[%c0_74, %c0_75, %c0_76, %c0_77] : memref<1x2x16x32xf32, #tpu.memory_space<vmem>>, vector<1x2x16x32xf32>
    %240 = vector.shape_cast %239 : vector<1x2x16x32xf32> to vector<2x16x32xf32>
    %241 = vector.shape_cast %238 : vector<2x16x32xf32> to vector<1x2x16x32xf32>
    tpu.vector_store %arg17[%c0_74, %c0_75, %c0_76, %c0_77], %241 {strides = array<i32>} : memref<1x2x16x32xf32, #tpu.memory_space<vmem>>, vector<1x2x16x32xf32>,
    return
  }
  func.func @transform_0(%arg0: i32, %arg1: i32) -> (i32, i32, i32, i32) {
    %c0_i32 = arith.constant 0 : i32
    %c0_i32_0 = arith.constant 0 : i32
    %c0_i32_1 = arith.constant 0 : i32
    return %arg0, %arg1, %c0_i32, %c0_i32_0 : i32, i32, i32, i32
  }
  func.func @transform_1(%arg0: i32, %arg1: i32) -> (i32, i32, i32) {
    %c0_i32 = arith.constant 0 : i32
    %c0_i32_0 = arith.constant 0 : i32
    %c0_i32_1 = arith.constant 0 : i32
    return %arg1, %c0_i32, %c0_i32_0 : i32, i32, i32
  }
  func.func @transform_2(%arg0: i32, %arg1: i32) -> (i32, i32, i32) {
    %c0_i32 = arith.constant 0 : i32
    %c0_i32_0 = arith.constant 0 : i32
    %c0_i32_1 = arith.constant 0 : i32
    %c0_i32_2 = arith.constant 0 : i32
    return %c0_i32, %c0_i32_0, %c0_i32_1 : i32, i32, i32
  }
  func.func @transform_3(%arg0: i32, %arg1: i32) -> (i32, i32) {
    %c0_i32 = arith.constant 0 : i32
    %c0_i32_0 = arith.constant 0 : i32
    %c0_i32_1 = arith.constant 0 : i32
    return %c0_i32, %c0_i32_0 : i32, i32
  }
  func.func @transform_4(%arg0: i32, %arg1: i32) -> (i32, i32) {
    %c0_i32 = arith.constant 0 : i32
    %c0_i32_0 = arith.constant 0 : i32
    %c0_i32_1 = arith.constant 0 : i32
    return %c0_i32, %c0_i32_0 : i32, i32
  }
  func.func @transform_5(%arg0: i32, %arg1: i32) -> (i32, i32) {
    %c0_i32 = arith.constant 0 : i32
    %c0_i32_0 = arith.constant 0 : i32
    %c0_i32_1 = arith.constant 0 : i32
    return %c0_i32, %c0_i32_0 : i32, i32
  }
  func.func @transform_6(%arg0: i32, %arg1: i32) -> (i32, i32) {
    %c0_i32 = arith.constant 0 : i32
    %c0_i32_0 = arith.constant 0 : i32
    %c0_i32_1 = arith.constant 0 : i32
    return %c0_i32, %c0_i32_0 : i32, i32
  }
  func.func @transform_7(%arg0: i32, %arg1: i32) -> (i32, i32, i32) {
    %c0_i32 = arith.constant 0 : i32
    %c0_i32_0 = arith.constant 0 : i32
    %c0_i32_1 = arith.constant 0 : i32
    %c0_i32_2 = arith.constant 0 : i32
    return %c0_i32, %c0_i32_0, %c0_i32_1 : i32, i32, i32
  }
  func.func @transform_8(%arg0: i32, %arg1: i32) -> (i32, i32) {
    %c0_i32 = arith.constant 0 : i32
    %c0_i32_0 = arith.constant 0 : i32
    %c0_i32_1 = arith.constant 0 : i32
    return %c0_i32, %c0_i32_0 : i32, i32
  }
  func.func @transform_9(%arg0: i32, %arg1: i32) -> (i32, i32) {
    %c0_i32 = arith.constant 0 : i32
    %c0_i32_0 = arith.constant 0 : i32
    %c0_i32_1 = arith.constant 0 : i32
    return %c0_i32, %c0_i32_0 : i32, i32
  }
  func.func @transform_10(%arg0: i32, %arg1: i32) -> (i32, i32) {
    %c0_i32 = arith.constant 0 : i32
    %c0_i32_0 = arith.constant 0 : i32
    %c0_i32_1 = arith.constant 0 : i32
    return %c0_i32, %c0_i32_0 : i32, i32
  }
  func.func @transform_11(%arg0: i32, %arg1: i32) -> (i32, i32) {
    %c0_i32 = arith.constant 0 : i32
    %c0_i32_0 = arith.constant 0 : i32
    %c0_i32_1 = arith.constant 0 : i32
    return %c0_i32, %c0_i32_0 : i32, i32
  }
  func.func @transform_12(%arg0: i32, %arg1: i32) -> (i32, i32) {
    %c0_i32 = arith.constant 0 : i32
    %c0_i32_0 = arith.constant 0 : i32
    %c0_i32_1 = arith.constant 0 : i32
    return %c0_i32, %c0_i32_0 : i32, i32
  }
  func.func @transform_13(%arg0: i32, %arg1: i32) -> (i32, i32) {
    %c0_i32 = arith.constant 0 : i32
    %c0_i32_0 = arith.constant 0 : i32
    %c0_i32_1 = arith.constant 0 : i32
    return %c0_i32, %c0_i32_0 : i32, i32
  }
  func.func @transform_14(%arg0: i32, %arg1: i32) -> (i32, i32) {
    %c0_i32 = arith.constant 0 : i32
    %c0_i32_0 = arith.constant 0 : i32
    %c0_i32_1 = arith.constant 0 : i32
    return %c0_i32, %c0_i32_0 : i32, i32
  }
  func.func @transform_15(%arg0: i32, %arg1: i32) -> (i32, i32, i32, i32) {
    %c0_i32 = arith.constant 0 : i32
    %c0_i32_0 = arith.constant 0 : i32
    %c0_i32_1 = arith.constant 0 : i32
    return %arg0, %arg1, %c0_i32, %c0_i32_0 : i32, i32, i32, i32
  }
}

</mosaic_0001>

<bundles_post_ra>
// kernel: swin_block_forward.1
= control target key start
LH: loop header
LB: loop body
LE: loop exit
PB: predicated region body
PF: predicated region fallthrough
CT: control target
= control target key end

     0   :  { %s3021_s18 = smov 0   ;;  %s3023_s19 = smov 0   ;;  %s3447_s0 = inlined_call_operand.vmem [shape: f32[2,4,16,32], index: 0, kind: input, shape index: {}]   ;;  %s3448_s1 = inlined_call_operand.vmem [shape: f32[4,16,16], index: 1, kind: input, shape index: {}]   ;;  %s3449_s2 = inlined_call_operand.vmem [shape: f32[4,16,16], index: 2, kind: input, shape index: {}]   ;;  %s3450_s3 = inlined_call_operand.vmem [shape: f32[1,32], index: 3, kind: input, shape index: {}]   ;;  %s3451_s4 = inlined_call_operand.vmem [shape: f32[1,32], index: 4, kind: input, shape index: {}]   ;;  %s3452_s5 = inlined_call_operand.vmem [shape: bf16[32,96], index: 5, kind: input, shape index: {}]   ;;  %s3453_s6 = inlined_call_operand.vmem [shape: f32[1,96], index: 6, kind: input, shape index: {}]   ;;  %s3454_s7 = inlined_call_operand.vmem [shape: bf16[4,8,32], index: 7, kind: input, shape index: {}]   ;;  %s3455_s8 = inlined_call_operand.vmem [shape: f32[1,32], index: 8, kind: input, shape index: {}]   ;;  %s3456_s9 = inlined_call_operand.vmem [shape: f32[1,32], index: 9, kind: input, shape index: {}]   ;;  %s3457_s10 = inlined_call_operand.vmem [shape: f32[1,32], index: 10, kind: input, shape index: {}]   ;;  %s3458_s11 = inlined_call_operand.vmem [shape: bf16[32,128], index: 11, kind: input, shape index: {}]   ;;  %s3459_s12 = inlined_call_operand.vmem [shape: f32[1,128], index: 12, kind: input, shape index: {}]   ;;  %s3460_s13 = inlined_call_operand.vmem [shape: bf16[128,32], index: 13, kind: input, shape index: {}]   ;;  %s3461_s14 = inlined_call_operand.vmem [shape: f32[1,32], index: 14, kind: input, shape index: {}]   ;;  %s3462_s15 = inlined_call_operand.vmem [shape: f32[2,4,16,32], index: 15, kind: output, shape index: {}]  }
   0x1   :  { %3464 = sst [smem:[#allocation2_spill]] %s3447_s0  ;;  %s3025_s20 = smov 0  }
   0x2   :  { %s3027_s21 = smov 0   ;;  %s3029_s22 = smov 0  }
   0x3 LB: > { %s34_s23 = sadd.s32 1, %s2918_s20  ;;  %s37_s24 = sadd.s32 1, %s2922_s21  ;;  %s2926_s22 = sphi %s3029_s22, %s25_s22   ;;  %s2922_s21 = sphi %s3027_s21, %s3470_s21   ;;  %s2918_s20 = sphi %s3025_s20, %s3469_s20   ;;  %s2914_s19 = sphi %s3023_s19, %s3468_s19   ;;  %s2910_s18 = sphi %s3021_s18, %s3467_s18  }
   0x4   : > { %p35_p0 = scmp.ge.s32.totalorder %s34_s23, 2  ;;  %p2434_p1 = scmp.ge.s32.totalorder %s2926_s22, 1 }
   0x5   : > { %p471_p2 = scmp.lt.s32.totalorder %s2926_s22, 5 }
   0x6   : > { %s3472_s23 = smov (%p35_p0, %s34_s23), 0  ;;  %s3474_s24 = smov (!%p35_p0, %s37_s24), %s2922_s21 }
   0x7   : > { %p472_p3 = pnand %p2434_p1, %p471_p2  ;;  %p39_p4 = scmp.ge.s32.totalorder %s3474_s24, 2 }
   0x8   : > { %s2435_s25 = sshll.u32 (!%p472_p3), %s2910_s18, 1  ;;  %p536_p5 = scmp.lt.s32.totalorder (!%p472_p3), %s2914_s19, 1  ;;  %vm571_vm0 = vcmask (!%p472_p3), 261120   ;;  %v2784_v28 = vld [vmem:[%s3452_s5] sm:$0xff] (!%p472_p3)   ;;  %v2785_v29 = vld [vmem:[%s3452_s5 + $0x8] sm:$0xff] (!%p472_p3)   ;;  %v2928_v62 = vmov (!%p472_p3), 0.0  }
   0x9   : > { %s3476_s24 = smov (%p39_p4, %s3474_s24), 0  ;;  %475 = sbr.rel (%p472_p3) target bundleno = 4304 (0x10d0), region = 80 }
   0xa   : > { %p538_p6 = scmp.lt.s32.totalorder (!%p472_p3), %s2435_s25, 3  ;;  %s3465_s0 = sld [smem:[#allocation2_spill]] (!%p472_p3)  ;;  %2559 = vmatprep.subr.bf16.mxu1 (!%p472_p3), %v2784_v28  ;;  %v2446_v44 = vld [vmem:[%s3450_s3] ss:$0 sm:$0xff] (!%p472_p3)  ;;  %2585 = vmatprep.subr.bf16.mxu0 (!%p472_p3), %v2928_v62  ;;  %vm2929_vm1 = vmmov (!%p472_p3), 0   ;;  %vm752_vm2 = vcmask (!%p472_p3), 64512  }
   0xb   : > { %2560 = vmatpush3.bf16.msra.mxu1 (!%p472_p3), %v2784_v28  ;;  %v2447_v50 = vld [vmem:[%s3451_s4] ss:$0 sm:$0xff] (!%p472_p3)  ;;  %2587 = vmatprep.mubr.msk.bf16.mxu0 (!%p472_p3), %vm2929_vm1, %v2928_v62  ;;  %s2930_s30 = smov (!%p472_p3), 96   ;;  %vm854_vm3 = vcmask (!%p472_p3), 130048   ;;  %s2933_s16 = smov (!%p472_p3), 120   ;;  %vm1253_vm4 = vcmask (!%p472_p3), 1043456  }
   0xc   : > { %2561 = vmatprep.subr.bf16.mxu1 (!%p472_p3), %v2785_v29  ;;  %v2448_v63 = vld [vmem:[%s3453_s6] ss:$0 sm:$0xff] (!%p472_p3) }
   0xf   : > { %2562 = vmatpush3.bf16.msra.mxu1 (!%p472_p3), %v2785_v29 }
  0x10   : > { %s3478_s19 = smov (!%p536_p5, %s2914_s19), 1  ;;  %s3480_s25 = smov (!%p538_p6, %s2435_s25), 3  ;;  %2567 = vmatprep.subr.bf16.mxu1 %v2928_v62 }
  0x11   : > { %s2437_s26 = sshll.u32 %s3478_s19, 3  ;;  %s2436_s27 = sshll.u32 %s3480_s25, 1 }
  0x12   : > { %s3054_s28 = sadd.s32 %s2437_s26, %s2436_s27  ;;  %s2496_s27 = sshll.u32 %s3480_s25, 4 }
  0x13   : > { %s3463_s29 = sshll.u32 %s3054_s28, 3  ;;  %s2931_s25 = smov 88  }
  0x14   : > { %s3062_s17 = scalar_lea.vmem %s3465_s0, %s3463_s29  ;;  %s3131_s0 = scalar_lea.vmem %s3448_s1, %s2496_s27 }
  0x15   : > { %v565_v0 = vld [vmem:[%s3062_s17] sm:$0xff]  ;;  %v567_v1 = vld [vmem:[%s3062_s17 + $0x10] sm:$0xff]  ;;  %v566_v2 = vld [vmem:[%s3062_s17 + $0x8] sm:$0xff]  ;;  %s2932_s29 = smov 64   ;;  %s2934_s27 = smov 80  }
  0x16   : > { %v572_v3 = vsel %vm571_vm0, %v565_v0, 0.0  ;;  %v578_v4 = vsel %vm571_vm0, %v567_v1, 0.0  ;;  %v568_v5 = vld [vmem:[%s3062_s17 + $0x18] sm:$0xff]  ;;  %v575_v6 = vsel %vm571_vm0, %v566_v2, 0.0  ;;  %v3134_v29 = vld [vmem:[%s3131_s0 + $0x10] sm:$0xff] }
  0x17   : > { %573 = vadd.xlane.f32.xlu0 %v572_v3  ;;  %579 = vadd.xlane.f32.xlu1 %v578_v4  ;;  %v581_v7 = vsel %vm571_vm0, %v568_v5, 0.0 }
  0x1b   : > { %576 = vadd.xlane.f32.xlu0 %v575_v6  ;;  %582 = vadd.xlane.f32.xlu1 %v581_v7 }
  0xa4   : > { %v574_v8 = vpop.xlane.xlu0 %573  ;;  %v580_v9 = vpop.xlane.xlu1 %579 }
  0xa5   : > { %v585_v10 = vmul.f32 0.03125, %v574_v8  ;;  %v587_v11 = vmul.f32 0.03125, %v580_v9 }
  0xa7   : > { %v589_v12 = vsub.f32 %v565_v0, %v585_v10  ;;  %v591_v13 = vsub.f32 %v567_v1, %v587_v11 }
  0xa8   : > { %v577_v14 = vpop.xlane.xlu0 %576  ;;  %v583_v15 = vpop.xlane.xlu1 %582 }
  0xa9   : > { %v586_v16 = vmul.f32 0.03125, %v577_v14  ;;  %v588_v17 = vmul.f32 0.03125, %v583_v15  ;;  %v593_v18 = vmul.f32 %v589_v12, %v589_v12  ;;  %v595_v19 = vmul.f32 %v591_v13, %v591_v13 }
  0xab   : > { %v590_v20 = vsub.f32 %v566_v2, %v586_v16  ;;  %v592_v21 = vsub.f32 %v568_v5, %v588_v17  ;;  %v597_v22 = vsel %vm571_vm0, %v593_v18, 0.0  ;;  %v603_v23 = vsel %vm571_vm0, %v595_v19, 0.0 }
  0xac   : > { %598 = vadd.xlane.f32.xlu0 %v597_v22  ;;  %v730_v22 = vld [vmem:[%s3449_s2 + $0x8] sm:$0xff] }
  0xad   : > { %v594_v24 = vmul.f32 %v590_v20, %v590_v20  ;;  %v596_v25 = vmul.f32 %v592_v21, %v592_v21 }
  0xaf   : > { %v600_v26 = vsel %vm571_vm0, %v594_v24, 0.0  ;;  %v606_v27 = vsel %vm571_vm0, %v596_v25, 0.0 }
  0xb0   : > { %604 = vadd.xlane.f32.xlu0 %v603_v23  ;;  %601 = vadd.xlane.f32.xlu1 %v600_v26 }
  0xb4   : > { %607 = vadd.xlane.f32.xlu1 %v606_v27 }
 0x139   : > { %v599_v30 = vpop.xlane.xlu0 %598 }
 0x13a   : > { %v609_v31 = vmul.f32 0.03125, %v599_v30 }
 0x13c   : > { %v613_v32 = vadd.f32 1e-05, %v609_v31 }
 0x13d   : > { %v602_v33 = vpop.xlane.xlu1 %601  ;;  %v605_v34 = vpop.xlane.xlu0 %604 }
 0x13e   : > { %2796 = vrsqrt.f32 %v613_v32  ;;  %v610_v35 = vmul.f32 0.03125, %v602_v33  ;;  %v611_v36 = vmul.f32 0.03125, %v605_v34  ;;  %v3137_v33 = vld [vmem:[%s3131_s0 + $0x18] sm:$0xff] }
 0x140   : > { %v614_v37 = vadd.f32 1e-05, %v610_v35  ;;  %v615_v38 = vadd.f32 1e-05, %v611_v36 }
 0x141   : > { %v608_v39 = vpop.xlane.xlu1 %607 }
 0x142   : > { %2798 = vrsqrt.f32 %v614_v37  ;;  %v612_v40 = vmul.f32 0.03125, %v608_v39 }
 0x143   : > { %2800 = vrsqrt.f32 %v615_v38 }
 0x144   : > { %v616_v41 = vadd.f32 1e-05, %v612_v40 }
 0x146   : > { %2802 = vrsqrt.f32 %v616_v41 }
 0x148   : > { %v2797_v42 = vpop.eup %2796 }
 0x149   : > { %v621_v43 = vmul.f32 %v2797_v42, %v589_v12 }
 0x14b   : > { %v631_v48 = vmul.f32 %v2446_v44, %v621_v43 }
 0x14c   : > { %v2799_v45 = vpop.eup %2798 }
 0x14d   : > { %v2801_v46 = vpop.eup %2800  ;;  %v622_v47 = vmul.f32 %v2799_v45, %v590_v20  ;;  %v641_v54 = vadd.f32 %v2447_v50, %v631_v48  ;;  %v729_v20 = vld [vmem:[%s3449_s2] sm:$0xff] }
 0x14e   : > { %v623_v49 = vmul.f32 %v2801_v46, %v591_v13 }
 0x14f   : > { %v632_v51 = vmul.f32 %v2446_v44, %v622_v47 }
 0x150   : > { %v2803_v52 = vpop.eup %2802  ;;  %v633_v56 = vmul.f32 %v2446_v44, %v623_v49 }
 0x151   : > { %v624_v53 = vmul.f32 %v2803_v52, %v592_v21  ;;  %v642_v55 = vadd.f32 %v2447_v50, %v632_v51  ;;  %v3154_v52 = vld [vmem:[%s3131_s0] sm:$0xff] }
 0x152   : > { %v643_v59 = vadd.f32 %v2447_v50, %v633_v56 }
 0x153   : > { %v645_v57 = vpack.c.bf16 %v642_v55, %v641_v54  ;;  %v634_v58 = vmul.f32 %v2446_v44, %v624_v53 }
 0x155   : > { %2563 = vmatprep.mubr.msk.bf16.mxu1 %vm571_vm0, %v645_v57  ;;  %v644_v60 = vadd.f32 %v2447_v50, %v634_v58  ;;  %v3150_v50 = vld [vmem:[%s3131_s0 + $0x8] sm:$0xff]  ;;  %s3466_s0 = sshll.u32 %s3054_s28, 3 }
 0x156   : > { %s562_s19 = scalar_lea.vmem %s3462_s15, %s3466_s0 }
 0x157   : > { %v646_v61 = vpack.c.bf16 %v644_v60, %v643_v59 }
 0x159   : > { %2564 = vmatmul.mubr.msk.bf16.vlgmr.msra.gmra.mrb[0].mxu1 %vm571_vm0, %v646_v61 }
 0x15a   : > { %2569 = vmatprep.mubr.msk.bf16.mxu1 %vm2929_vm1, %v2928_v62 }
 0x22c   : > { %v2565_v0 = vpop.f32.mrb[0].mxu1 }
 0x22d   : > { %v719_v1 = vadd.f32 %v2565_v0, %v2448_v63  ;;  %v710_v2 = vpop.f32.mrb[1].mxu1 }
 0x22e   : > { %v711_v3 = vadd.f32 %v2448_v63, %v710_v2  ;;  %v2566_v4 = vpop.f32.mrb[2].mxu1 }
 0x22f   : > { %v722_v5 = vadd.f32 %v2566_v4, %v2448_v63  ;;  %v713_v6 = vpop.f32.mrb[3].mxu1  ;;  %v743_v8 = vmul.f32 0.35355338, %v719_v1 }
 0x230   : > { %v714_v7 = vadd.f32 %v2448_v63, %v713_v6  ;;  %v741_v11 = vmul.f32 0.35355338, %v711_v3 }
 0x231   : > { %v744_v9 = vmul.f32 0.35355338, %v722_v5  ;;  %v3099_v10 = vpack.c.bf16 %v722_v5, %v719_v1 }
 0x232   : > { %v742_v12 = vmul.f32 0.35355338, %v714_v7  ;;  %v3101_v13 = vpack.c.bf16 %v714_v7, %v711_v3 }
 0x233   : > { %v3103_v14 = vpack.c.bf16 %v744_v9, %v743_v8  ;;  %801 = vrot.lane.b32.xlu1 %v3099_v10, %s2930_s30 }
 0x234   : > { %v3106_v15 = vpack.c.bf16 %v742_v12, %v741_v11  ;;  %750 = vrot.lane.b32.xlu0 %v3101_v13, %s2930_s30  ;;  %s2935_s30 = smov 112  }
 0x2a5   : > { %v802_v18 = vpop.permute.xlu1 %801 }
 0x2a6   : > { %v751_v16 = vpop.permute.xlu0 %750  ;;  %v807_v19 = vsel %vm752_vm2, %v802_v18, 0 }
 0x2a7   : > { %v757_v17 = vsel %vm752_vm2, %v751_v16, 0 }
 0x2a8   : > { %2568 = vmatpush3.bf16.xpose.msra.mxu1 %v757_v17 }
 0x2a9   : > { %2573 = vmatprep.subr.bf16.mxu1 %v2928_v62 }
 0x2af   : > { %2570 = vmatmul.mubr.msk.bf16.vlgmr.msra.gmra.mrb[4].mxu1 %vm752_vm2, %v3106_v15 }
 0x2b0   : > { %2574 = vmatpush3.bf16.xpose.msra.mxu1 %v807_v19  ;;  %2575 = vmatprep.mubr.msk.bf16.mxu1 %vm2929_vm1, %v2928_v62 }
 0x2b1   : > { %2579 = vmatprep.subr.bf16.mxu1 %v2928_v62 }
 0x2b7   : > { %2576 = vmatmul.mubr.msk.bf16.vlgmr.msra.gmra.mrb[8].mxu1 %vm752_vm2, %v3103_v14 }
 0x2b8   : > { %2581 = vmatprep.mubr.msk.bf16.mxu1 %vm2929_vm1, %v2928_v62 }
 0x382   : > { %v793_v21 = vpop.f32.mrb[4].mxu1 }
 0x383   : > { %v794_v23 = vadd.f32 %v793_v21, %v729_v20  ;;  %v2571_v24 = vpop.f32.mrb[5].mxu1 }
 0x384   : > { %v796_v25 = vpop.f32.mrb[6].mxu1 }
 0x385   : > { %v797_v26 = vadd.f32 %v796_v25, %v730_v22  ;;  %v2572_v27 = vpop.f32.mrb[7].mxu1  ;;  %v850_v54 = vadd.f32 %v794_v23, %v3154_v52 }
 0x387   : > { %v851_v51 = vadd.f32 %v797_v26, %v3150_v50  ;;  %v855_v55 = vsel %vm854_vm3, %v850_v54, -inf }
 0x389   : > { %v858_v53 = vsel %vm854_vm3, %v851_v51, -inf }
 0x38a   : > { %v843_v28 = vpop.f32.mrb[8].mxu1 }
 0x38b   : > { %v844_v30 = vadd.f32 %v843_v28, %v729_v20  ;;  %v2577_v31 = vpop.f32.mrb[9].mxu1 }
 0x38c   : > { %v846_v32 = vpop.f32.mrb[10].mxu1 }
 0x38d   : > { %v847_v34 = vadd.f32 %v846_v32, %v730_v22  ;;  %v2578_v35 = vpop.f32.mrb[11].mxu1  ;;  %v852_v36 = vadd.f32 %v844_v30, %v3134_v29 }
 0x38f   : > { %v861_v37 = vsel %vm854_vm3, %v852_v36, -inf  ;;  %v853_v38 = vadd.f32 %v847_v34, %v3137_v33  ;;  %v731_v34 = vld [vmem:[%s3449_s2 + $0x10] sm:$0xff] }
 0x390   : > { %862 = vmax.xlane.f32.xlu1 %v861_v37  ;;  %v732_v37 = vld [vmem:[%s3449_s2 + $0x18] sm:$0xff] }
 0x391   : > { %v864_v39 = vsel %vm854_vm3, %v853_v38, -inf }
 0x392   : > { %865 = vmax.xlane.f32.xlu0 %v864_v39 }
 0x41d   : > { %v863_v40 = vpop.xlane.xlu1 %862 }
 0x41e   : > { %v869_v41 = vsub.f32 %v852_v36, %v863_v40 }
 0x41f   : > { %v866_v42 = vpop.xlane.xlu0 %865 }
 0x420   : > { %v875_v43 = vmul.f32 1.442695, %v869_v41  ;;  %v870_v44 = vsub.f32 %v853_v38, %v866_v42 }
 0x422   : > { %2804 = vpow2.f32 %v875_v43  ;;  %v877_v45 = vmul.f32 1.442695, %v870_v44 }
 0x424   : > { %2806 = vpow2.f32 %v877_v45 }
 0x42c   : > { %v2805_v46 = vpop.eup %2804 }
 0x42d   : > { %v885_v47 = vsel %vm854_vm3, %v2805_v46, 0.0 }
 0x42e   : > { %v2807_v48 = vpop.eup %2806  ;;  %886 = vadd.xlane.f32.xlu0 %v885_v47 }
 0x42f   : > { %v888_v49 = vsel %vm854_vm3, %v2807_v48, 0.0 }
 0x430   : > { %889 = vadd.xlane.f32.xlu1 %v888_v49 }
 0x441   : > { %1052 = vrot.lane.b32.xlu1 %v3099_v10, %s2931_s25 }
 0x444   : > { %948 = vrot.lane.b32.xlu0 %v3099_v10, %s2932_s29 }
 0x445   : > { %1050 = vrot.lane.b32.xlu1 %v3103_v14, %s2933_s16 }
 0x463   : > { %859 = vmax.xlane.f32.xlu0 %v858_v53 }
 0x469   : > { %856 = vmax.xlane.f32.xlu1 %v855_v55 }
 0x47a   : > { %901 = vrot.lane.b32.xlu1 %v3101_v13, %s2932_s29  ;;  %s2938_s29 = smov 72  }
 0x47e   : > { %998 = vrot.lane.b32.xlu1 %v3106_v15, %s2933_s16  ;;  %s2939_s16 = smov 104  }
 0x4bb   : > { %v887_v56 = vpop.xlane.xlu0 %886 }
 0x4bc   : > { %2808 = vrcp.f32 %v887_v56 }
 0x4bd   : > { %v890_v57 = vpop.xlane.xlu1 %889 }
 0x4be   : > { %2810 = vrcp.f32 %v890_v57 }
 0x4bf   : > { %v949_v58 = vpop.permute.xlu0 %948 }
 0x4c0   : > { %2586 = vmatpush3.bf16.msra.mxu0 %v949_v58 }
 0x4c1   : > { %2597 = vmatprep.subr.bf16.mxu0 %v2928_v62  ;;  %v1053_v0 = vpop.permute.xlu1 %1052 }
 0x4c2   : > { %v1058_v2 = vsel %vm752_vm2, %v1053_v0, 0 }
 0x4c5   : > { %v1051_v3 = vpop.permute.xlu1 %1050 }
 0x4c6   : > { %v2809_v59 = vpop.eup %2808 }
 0x4c7   : > { %v897_v61 = vmul.f32 %v2809_v59, %v2805_v46 }
 0x4c8   : > { %v2811_v60 = vpop.eup %2810 }
 0x4c9   : > { %v898_v63 = vmul.f32 %v2811_v60, %v2807_v48 }
 0x4cb   : > { %v900_v1 = vpack.c.bf16 %v898_v63, %v897_v61 }
 0x4cd   : > { %2588 = vmatmul.mubr.msk.bf16.vlgmr.msra.gmra.mrb[0].mxu0 %vm854_vm3, %v900_v1 }
 0x4ce   : > { %2598 = vmatpush3.bf16.xpose.msra.mxu0 %v1058_v2  ;;  %2599 = vmatprep.mubr.msk.bf16.mxu0 %vm2929_vm1, %v2928_v62 }
 0x4cf   : > { %2609 = vmatprep.subr.bf16.mxu0 %v2928_v62 }
 0x4d5   : > { %2600 = vmatmul.mubr.msk.bf16.vlgmr.msra.gmra.mrb[4].mxu0 %vm752_vm2, %v1051_v3 }
 0x4d6   : > { %2611 = vmatprep.mubr.msk.bf16.mxu0 %vm2929_vm1, %v2928_v62 }
 0x4f0   : > { %v860_v4 = vpop.xlane.xlu0 %859 }
 0x4f1   : > { %v868_v5 = vsub.f32 %v851_v51, %v860_v4 }
 0x4f3   : > { %v873_v8 = vmul.f32 1.442695, %v868_v5 }
 0x4f6   : > { %v857_v6 = vpop.xlane.xlu1 %856 }
 0x4f7   : > { %v867_v7 = vsub.f32 %v850_v54, %v857_v6 }
 0x4f9   : > { %v871_v9 = vmul.f32 1.442695, %v867_v7 }
 0x4fa   : > { %v902_v11 = vpop.permute.xlu1 %901 }
 0x4fb   : > { %2812 = vpow2.f32 %v871_v9  ;;  %2580 = vmatpush3.bf16.msra.mxu1 %v902_v11 }
 0x4fc   : > { %2591 = vmatprep.subr.bf16.mxu1 %v2928_v62  ;;  %2814 = vpow2.f32 %v873_v8 }
 0x4fe   : > { %v999_v46 = vpop.permute.xlu1 %998 }
 0x505   : > { %v2813_v12 = vpop.eup %2812 }
 0x506   : > { %v879_v16 = vsel %vm854_vm3, %v2813_v12, 0.0  ;;  %v2815_v17 = vpop.eup %2814 }
 0x507   : > { %880 = vadd.xlane.f32.xlu0 %v879_v16  ;;  %v882_v18 = vsel %vm854_vm3, %v2815_v17, 0.0 }
 0x50b   : > { %883 = vadd.xlane.f32.xlu0 %v882_v18 }
 0x521   : > { %1000 = vrot.lane.b32.xlu0 %v3101_v13, %s2931_s25  ;;  %s2936_s25 = smov 56  }
 0x594   : > { %v881_v19 = vpop.xlane.xlu0 %880 }
 0x595   : > { %2816 = vrcp.f32 %v881_v19 }
 0x598   : > { %v884_v20 = vpop.xlane.xlu0 %883 }
 0x599   : > { %2818 = vrcp.f32 %v884_v20 }
 0x59c   : > { %v1001_v31 = vpop.permute.xlu0 %1000 }
 0x59d   : > { %v1006_v35 = vsel %vm752_vm2, %v1001_v31, 0 }
 0x59f   : > { %v2817_v22 = vpop.eup %2816 }
 0x5a0   : > { %v3175_v21 = vpop.f32.mrb[0].mxu0  ;;  %v895_v28 = vmul.f32 %v2817_v22, %v2813_v12 }
 0x5a1   : > { %v2589_v23 = vpop.f32.mrb[1].mxu0 }
 0x5a2   : > { %v3177_v24 = vpop.f32.mrb[2].mxu0 }
 0x5a3   : > { %v2819_v25 = vpop.eup %2818  ;;  %v996_v26 = vpack.c.bf16 %v3177_v24, %v3175_v21  ;;  %v2590_v27 = vpop.f32.mrb[3].mxu0 }
 0x5a4   : > { %v896_v30 = vmul.f32 %v2819_v25, %v2815_v17 }
 0x5a6   : > { %v899_v32 = vpack.c.bf16 %v896_v30, %v895_v28 }
 0x5a8   : > { %2582 = vmatmul.mubr.msk.bf16.vlgmr.msra.gmra.mrb[12].mxu1 %vm854_vm3, %v899_v32  ;;  %v1094_v36 = vpop.f32.mrb[4].mxu0 }
 0x5a9   : > { %2592 = vmatpush3.bf16.xpose.msra.mxu1 %v1006_v35  ;;  %v1095_v38 = vadd.f32 %v1094_v36, %v731_v34  ;;  %v2601_v39 = vpop.f32.mrb[5].mxu0  ;;  %2593 = vmatprep.mubr.msk.bf16.mxu1 %vm2929_vm1, %v2928_v62 }
 0x5aa   : > { %v1097_v40 = vpop.f32.mrb[6].mxu0  ;;  %2603 = vmatprep.subr.bf16.mxu1 %v2928_v62 }
 0x5ab   : > { %v1098_v41 = vadd.f32 %v1097_v40, %v732_v37  ;;  %v2602_v42 = vpop.f32.mrb[7].mxu0  ;;  %v1103_v43 = vadd.f32 %v1095_v38, %v3134_v29 }
 0x5ad   : > { %v1111_v44 = vsel %vm854_vm3, %v1103_v43, -inf  ;;  %v1104_v45 = vadd.f32 %v1098_v41, %v3137_v33 }
 0x5ae   : > { %1112 = vmax.xlane.f32.xlu1 %v1111_v44 }
 0x5af   : > { %v1114_v47 = vsel %vm854_vm3, %v1104_v45, -inf }
 0x5b0   : > { %1115 = vmax.xlane.f32.xlu0 %v1114_v47  ;;  %2594 = vmatmul.mubr.msk.bf16.vlgmr.msra.gmra.mrb[16].mxu1 %vm752_vm2, %v999_v46 }
 0x5b1   : > { %2605 = vmatprep.mubr.msk.bf16.mxu1 %vm2929_vm1, %v2928_v62 }
 0x5bf   : > { %1366 = vrot.lane.b32.xlu1 %v3101_v13, %s2934_s27 }
 0x63b   : > { %v1113_v48 = vpop.xlane.xlu1 %1112 }
 0x63c   : > { %v1119_v49 = vsub.f32 %v1103_v43, %v1113_v48 }
 0x63d   : > { %v1116_v51 = vpop.xlane.xlu0 %1115 }
 0x63e   : > { %v1125_v53 = vmul.f32 1.442695, %v1119_v49  ;;  %v1120_v54 = vsub.f32 %v1104_v45, %v1116_v51 }
 0x63f   : > { %v1367_v16 = vpop.permute.xlu1 %1366 }
 0x640   : > { %2820 = vpow2.f32 %v1125_v53  ;;  %v1127_v55 = vmul.f32 1.442695, %v1120_v54  ;;  %v1372_v30 = vsel %vm752_vm2, %v1367_v16, 0 }
 0x642   : > { %2822 = vpow2.f32 %v1127_v55 }
 0x64a   : > { %v2821_v56 = vpop.eup %2820 }
 0x64b   : > { %v1135_v57 = vsel %vm854_vm3, %v2821_v56, 0.0 }
 0x64c   : > { %v2823_v58 = vpop.eup %2822  ;;  %1136 = vadd.xlane.f32.xlu0 %v1135_v57 }
 0x64d   : > { %v1138_v59 = vsel %vm854_vm3, %v2823_v58, 0.0 }
 0x64e   : > { %1139 = vadd.xlane.f32.xlu1 %v1138_v59  ;;  %v733_v59 = vld [vmem:[%s3449_s2 + $0x20] sm:$0xff] }
 0x65f   : > { %1364 = vrot.lane.b32.xlu1 %v3106_v15, %s2935_s30 }
 0x662   : > { %1198 = vrot.lane.b32.xlu0 %v3099_v10, %s2936_s25 }
 0x663   : > { %1417 = vrot.lane.b32.xlu1 %v3099_v10, %s2934_s27 }
 0x666   : > { %1415 = vrot.lane.b32.xlu0 %v3103_v14, %s2935_s30 }
 0x67b   : > { %v3206_v60 = vpop.f32.mrb[12].mxu1 }
 0x67c   : > { %v2583_v61 = vpop.f32.mrb[13].mxu1 }
 0x67d   : > { %v3208_v63 = vpop.f32.mrb[14].mxu1 }
 0x67e   : > { %v995_v0 = vpack.c.bf16 %v3208_v63, %v3206_v60  ;;  %v2584_v1 = vpop.f32.mrb[15].mxu1 }
 0x683   : > { %v1042_v2 = vpop.f32.mrb[16].mxu1 }
 0x684   : > { %v1043_v3 = vadd.f32 %v1042_v2, %v731_v34  ;;  %v2595_v4 = vpop.f32.mrb[17].mxu1  ;;  %v734_v2 = vld [vmem:[%s3449_s2 + $0x28] sm:$0xff] }
 0x685   : > { %v1045_v5 = vpop.f32.mrb[18].mxu1 }
 0x686   : > { %v1046_v6 = vadd.f32 %v1045_v5, %v732_v37  ;;  %v2596_v7 = vpop.f32.mrb[19].mxu1  ;;  %v1101_v8 = vadd.f32 %v1043_v3, %v3154_v52 }
 0x688   : > { %v1105_v9 = vsel %vm854_vm3, %v1101_v8, -inf  ;;  %v1102_v11 = vadd.f32 %v1046_v6, %v3150_v50 }
 0x689   : > { %1106 = vmax.xlane.f32.xlu1 %v1105_v9 }
 0x68a   : > { %v1108_v12 = vsel %vm854_vm3, %v1102_v11, -inf }
 0x68b   : > { %1109 = vmax.xlane.f32.xlu0 %v1108_v12 }
 0x69a   : > { %1151 = vrot.lane.b32.xlu1 %v3101_v13, %s2936_s25  ;;  %s2937_s25 = smov 48  }
 0x6d9   : > { %v1137_v17 = vpop.xlane.xlu0 %1136 }
 0x6da   : > { %2824 = vrcp.f32 %v1137_v17 }
 0x6db   : > { %v1140_v18 = vpop.xlane.xlu1 %1139 }
 0x6dc   : > { %2826 = vrcp.f32 %v1140_v18 }
 0x6dd   : > { %v1199_v19 = vpop.permute.xlu0 %1198 }
 0x6de   : > { %2610 = vmatpush3.bf16.msra.mxu0 %v1199_v19 }
 0x6df   : > { %2627 = vmatprep.subr.bf16.mxu0 %v2928_v62  ;;  %v1365_v28 = vpop.permute.xlu1 %1364 }
 0x6e1   : > { %v1416_v34 = vpop.permute.xlu0 %1415 }
 0x6e3   : > { %v1418_v31 = vpop.permute.xlu1 %1417 }
 0x6e4   : > { %v2825_v20 = vpop.eup %2824  ;;  %v1423_v32 = vsel %vm752_vm2, %v1418_v31, 0 }
 0x6e5   : > { %v1147_v23 = vmul.f32 %v2825_v20, %v2821_v56 }
 0x6e6   : > { %v2827_v22 = vpop.eup %2826 }
 0x6e7   : > { %v1148_v25 = vmul.f32 %v2827_v22, %v2823_v58 }
 0x6e9   : > { %v1150_v27 = vpack.c.bf16 %v1148_v25, %v1147_v23 }
 0x6eb   : > { %2612 = vmatmul.mubr.msk.bf16.vlgmr.msra.gmra.mrb[8].mxu0 %vm854_vm3, %v1150_v27 }
 0x6ec   : > { %2628 = vmatpush3.bf16.xpose.msra.mxu0 %v1372_v30  ;;  %2629 = vmatprep.mubr.msk.bf16.mxu0 %vm2929_vm1, %v2928_v62  ;;  %v738_v30 = vld [vmem:[%s3454_s7 + $0x4] sm:$0xf] }
 0x6ed   : > { %2633 = vmatprep.subr.bf16.mxu0 %v2928_v62  ;;  %v1255_v31 = vsel %vm1253_vm4, %v738_v30, 0 }
 0x6f3   : > { %2630 = vmatmul.mubr.msk.bf16.vlgmr.msra.gmra.mrb[12].mxu0 %vm752_vm2, %v1365_v28 }
 0x6f4   : > { %2634 = vmatpush3.bf16.xpose.msra.mxu0 %v1423_v32  ;;  %2635 = vmatprep.mubr.msk.bf16.mxu0 %vm2929_vm1, %v2928_v62  ;;  %v737_v32 = vld [vmem:[%s3454_s7] sm:$0xf] }
 0x6f5   : > { %2645 = vmatprep.subr.bf16.mxu0 %v2928_v62 }
 0x6fb   : > { %2636 = vmatmul.mubr.msk.bf16.vlgmr.msra.gmra.mrb[16].mxu0 %vm752_vm2, %v1416_v34 }
 0x6fc   : > { %2647 = vmatprep.mubr.msk.bf16.mxu0 %vm2929_vm1, %v2928_v62 }
 0x716   : > { %v1107_v35 = vpop.xlane.xlu1 %1106 }
 0x717   : > { %v1117_v36 = vsub.f32 %v1101_v8, %v1107_v35 }
 0x718   : > { %v1110_v37 = vpop.xlane.xlu0 %1109 }
 0x719   : > { %v1121_v38 = vmul.f32 1.442695, %v1117_v36  ;;  %v1118_v39 = vsub.f32 %v1102_v11, %v1110_v37 }
 0x71a   : > { %v1152_v40 = vpop.permute.xlu1 %1151 }
 0x71b   : > { %2828 = vpow2.f32 %v1121_v38  ;;  %v1123_v41 = vmul.f32 1.442695, %v1118_v39  ;;  %2604 = vmatpush3.bf16.msra.mxu1 %v1152_v40 }
 0x71c   : > { %2727 = vmatprep.subr.msk.bf16.mxu1 %vm1253_vm4, %v738_v30 }
 0x71d   : > { %2830 = vpow2.f32 %v1123_v41 }
 0x725   : > { %v2829_v42 = vpop.eup %2828 }
 0x726   : > { %v1129_v43 = vsel %vm854_vm3, %v2829_v42, 0.0 }
 0x727   : > { %v2831_v44 = vpop.eup %2830  ;;  %1130 = vadd.xlane.f32.xlu0 %v1129_v43 }
 0x728   : > { %v1132_v45 = vsel %vm854_vm3, %v2831_v44, 0.0 }
 0x72b   : > { %1133 = vadd.xlane.f32.xlu0 %v1132_v45 }
 0x7b4   : > { %v1131_v46 = vpop.xlane.xlu0 %1130 }
 0x7b5   : > { %2832 = vrcp.f32 %v1131_v46 }
 0x7b8   : > { %v1134_v47 = vpop.xlane.xlu0 %1133 }
 0x7b9   : > { %2834 = vrcp.f32 %v1134_v47 }
 0x7be   : > { %v3233_v48 = vpop.f32.mrb[8].mxu0 }
 0x7bf   : > { %v2613_v49 = vpop.f32.mrb[9].mxu0  ;;  %v2833_v53 = vpop.eup %2832 }
 0x7c0   : > { %v3235_v51 = vpop.f32.mrb[10].mxu0  ;;  %v1145_v57 = vmul.f32 %v2833_v53, %v2829_v42 }
 0x7c1   : > { %v1246_v54 = vpack.c.bf16 %v3235_v51, %v3233_v48  ;;  %v2614_v55 = vpop.f32.mrb[11].mxu0 }
 0x7c3   : > { %v2835_v56 = vpop.eup %2834 }
 0x7c4   : > { %v1146_v58 = vmul.f32 %v2835_v56, %v2831_v44 }
 0x7c6   : > { %v1408_v61 = vpop.f32.mrb[12].mxu0  ;;  %v1149_v1 = vpack.c.bf16 %v1146_v58, %v1145_v57 }
 0x7c7   : > { %v1409_v3 = vadd.f32 %v1408_v61, %v733_v59  ;;  %v2631_v4 = vpop.f32.mrb[13].mxu0 }
 0x7c8   : > { %2606 = vmatmul.mubr.msk.bf16.vlgmr.msra.gmra.mrb[20].mxu1 %vm854_vm3, %v1149_v1  ;;  %v1411_v5 = vpop.f32.mrb[14].mxu0  ;;  %v1313_v4 = vsel %vm1253_vm4, %v737_v32, 0 }
 0x7c9   : > { %v1412_v6 = vadd.f32 %v1411_v5, %v734_v2  ;;  %v2632_v7 = vpop.f32.mrb[15].mxu0  ;;  %v1466_v8 = vadd.f32 %v1409_v3, %v3154_v52  ;;  %2616 = vmatpush3.bf16.msra.mxu1 %v1255_v31 }
 0x7ca   : > { %2728 = vmatprep.subr.msk.bf16.mxu1 %vm1253_vm4, %v737_v32 }
 0x7cb   : > { %v1470_v9 = vsel %vm854_vm3, %v1466_v8, -inf  ;;  %v1467_v11 = vadd.f32 %v1412_v6, %v3150_v50 }
 0x7cc   : > { %1471 = vmax.xlane.f32.xlu0 %v1470_v9 }
 0x7cd   : > { %v1473_v18 = vsel %vm854_vm3, %v1467_v11, -inf }
 0x7ce   : > { %v1459_v12 = vpop.f32.mrb[16].mxu0 }
 0x7cf   : > { %v1460_v16 = vadd.f32 %v1459_v12, %v733_v59  ;;  %v2637_v17 = vpop.f32.mrb[17].mxu0 }
 0x7d0   : > { %v1462_v19 = vpop.f32.mrb[18].mxu0  ;;  %1474 = vmax.xlane.f32.xlu0 %v1473_v18  ;;  %v739_v18 = vld [vmem:[%s3454_s7 + $0x8] sm:$0xf] }
 0x7d1   : > { %v1463_v20 = vadd.f32 %v1462_v19, %v734_v2  ;;  %v2638_v22 = vpop.f32.mrb[19].mxu0  ;;  %v1468_v23 = vadd.f32 %v1460_v16, %v3134_v29  ;;  %v1619_v19 = vsel %vm1253_vm4, %v739_v18, 0 }
 0x7d3   : > { %v1476_v25 = vsel %vm854_vm3, %v1468_v23, -inf  ;;  %v1469_v27 = vadd.f32 %v1463_v20, %v3137_v33 }
 0x7d4   : > { %1477 = vmax.xlane.f32.xlu0 %v1476_v25 }
 0x7d5   : > { %v1479_v28 = vsel %vm854_vm3, %v1469_v27, -inf }
 0x7d8   : > { %1480 = vmax.xlane.f32.xlu0 %v1479_v28 }
 0x859   : > { %v1472_v34 = vpop.xlane.xlu0 %1471 }
 0x85a   : > { %v1482_v35 = vsub.f32 %v1466_v8, %v1472_v34 }
 0x85c   : > { %v1486_v36 = vmul.f32 1.442695, %v1482_v35 }
 0x85d   : > { %v1475_v37 = vpop.xlane.xlu0 %1474 }
 0x85e   : > { %2836 = vpow2.f32 %v1486_v36  ;;  %v1483_v38 = vsub.f32 %v1467_v11, %v1475_v37  ;;  %v735_v36 = vld [vmem:[%s3449_s2 + $0x30] sm:$0xff] }
 0x860   : > { %v1488_v39 = vmul.f32 1.442695, %v1483_v38  ;;  %v736_v38 = vld [vmem:[%s3449_s2 + $0x38] sm:$0xff] }
 0x861   : > { %v1478_v40 = vpop.xlane.xlu0 %1477 }
 0x862   : > { %2838 = vpow2.f32 %v1488_v39  ;;  %v1484_v41 = vsub.f32 %v1468_v23, %v1478_v40 }
 0x864   : > { %v1490_v42 = vmul.f32 1.442695, %v1484_v41 }
 0x865   : > { %v1481_v43 = vpop.xlane.xlu0 %1480 }
 0x866   : > { %2840 = vpow2.f32 %v1490_v42  ;;  %v1485_v44 = vsub.f32 %v1469_v27, %v1481_v43 }
 0x868   : > { %v2837_v45 = vpop.eup %2836  ;;  %v1492_v46 = vmul.f32 1.442695, %v1485_v44 }
 0x869   : > { %v1494_v47 = vsel %vm854_vm3, %v2837_v45, 0.0 }
 0x86a   : > { %2842 = vpow2.f32 %v1492_v46  ;;  %1495 = vadd.xlane.f32.xlu1 %v1494_v47 }
 0x86c   : > { %v2839_v49 = vpop.eup %2838 }
 0x86d   : > { %v1497_v53 = vsel %vm854_vm3, %v2839_v49, 0.0 }
 0x86e   : > { %1498 = vadd.xlane.f32.xlu0 %v1497_v53 }
 0x870   : > { %v2841_v55 = vpop.eup %2840 }
 0x871   : > { %v1500_v56 = vsel %vm854_vm3, %v2841_v55, 0.0 }
 0x872   : > { %1501 = vadd.xlane.f32.xlu0 %v1500_v56 }
 0x874   : > { %v2843_v57 = vpop.eup %2842 }
 0x875   : > { %v1503_v58 = vsel %vm854_vm3, %v2843_v57, 0.0 }
 0x876   : > { %1504 = vadd.xlane.f32.xlu0 %v1503_v58 }
 0x87b   : > { %1563 = vrot.lane.b32.xlu1 %v3099_v10, %s2937_s25 }
 0x88c   : > { %1516 = vrot.lane.b32.xlu0 %v3101_v13, %s2937_s25  ;;  %s2940_s25 = smov 40  }
 0x890   : > { %1676 = vrot.lane.b32.xlu0 %v3101_v13, %s2938_s29 }
 0x894   : > { %1727 = vrot.lane.b32.xlu0 %v3099_v10, %s2938_s29 }
 0x898   : > { %1674 = vrot.lane.b32.xlu0 %v3106_v15, %s2939_s16 }
 0x89b   : > { %v1191_v59 = vpop.f32.mrb[20].mxu1 }
 0x89c   : > { %1725 = vrot.lane.b32.xlu0 %v3103_v14, %s2939_s16  ;;  %v2607_v61 = vpop.f32.mrb[21].mxu1 }
 0x89d   : > { %v1194_v1 = vpop.f32.mrb[22].mxu1 }
 0x89e   : > { %v1245_v2 = vpack.c.bf16 %v1194_v1, %v1191_v59  ;;  %v2608_v3 = vpop.f32.mrb[23].mxu1 }
 0x8a0   : > { %2617 = vmatprep.mubr.msk.bf16.mxu1 %vm752_vm2, %v1245_v2 }
 0x8a1   : > { %2618 = vmatmul.mubr.msk.bf16.vlgmr.msra.gmra.mrb[24].mxu1 %vm752_vm2, %v1246_v54 }
 0x8a2   : > { %2623 = vmatprep.mubr.msk.bf16.mxu1 %vm752_vm2, %v995_v0  ;;  %2622 = vmatpush3.bf16.msra.mxu1 %v1313_v4 }
 0x8a3   : > { %2639 = vmatprep.subr.bf16.mxu1 %v2928_v62 }
 0x8ad   : > { %2624 = vmatmul.mubr.msk.bf16.vlgmr.msra.gmra.mrb[24].mxu1 %vm752_vm2, %v996_v26 }
 0x8ae   : > { %2641 = vmatprep.mubr.msk.bf16.mxu1 %vm2929_vm1, %v2928_v62 }
 0x8f7   : > { %v1496_v14 = vpop.xlane.xlu1 %1495 }
 0x8f8   : > { %2844 = vrcp.f32 %v1496_v14 }
 0x8fb   : > { %v1564_v15 = vpop.permute.xlu1 %1563  ;;  %v1499_v48 = vpop.xlane.xlu0 %1498 }
 0x8fc   : > { %2846 = vrcp.f32 %v1499_v48  ;;  %2646 = vmatpush3.bf16.msra.mxu0 %v1564_v15 }
 0x8fd   : > { %2657 = vmatprep.subr.bf16.mxu0 %v2928_v62 }
 0x8ff   : > { %v1502_v60 = vpop.xlane.xlu0 %1501 }
 0x900   : > { %2848 = vrcp.f32 %v1502_v60 }
 0x902   : > { %v2845_v0 = vpop.eup %2844 }
 0x903   : > { %v1505_v63 = vpop.xlane.xlu0 %1504  ;;  %v1510_v21 = vmul.f32 %v2845_v0, %v2837_v45 }
 0x904   : > { %2850 = vrcp.f32 %v1505_v63 }
 0x906   : > { %v2847_v51 = vpop.eup %2846 }
 0x907   : > { %v1511_v24 = vmul.f32 %v2847_v51, %v2839_v49  ;;  %v1517_v26 = vpop.permute.xlu0 %1516 }
 0x908   : > { %2640 = vmatpush3.bf16.msra.mxu1 %v1517_v26 }
 0x909   : > { %v1514_v54 = vpack.c.bf16 %v1511_v24, %v1510_v21  ;;  %2729 = vmatprep.subr.msk.bf16.mxu1 %vm1253_vm4, %v739_v18 }
 0x90a   : > { %v2849_v5 = vpop.eup %2848 }
 0x90b   : > { %2642 = vmatmul.mubr.msk.bf16.vlgmr.msra.gmra.mrb[28].mxu1 %vm854_vm3, %v1514_v54  ;;  %v1677_v7 = vpop.permute.xlu0 %1676  ;;  %v1512_v8 = vmul.f32 %v2849_v5, %v2841_v55 }
 0x90c   : > { %v1682_v12 = vsel %vm752_vm2, %v1677_v7, 0  ;;  %2652 = vmatpush3.bf16.msra.mxu1 %v1619_v19 }
 0x90d   : > { %2663 = vmatprep.subr.bf16.mxu1 %v2928_v62 }
 0x90e   : > { %v2851_v6 = vpop.eup %2850 }
 0x90f   : > { %v1513_v9 = vmul.f32 %v2851_v6, %v2843_v57  ;;  %v1728_v16 = vpop.permute.xlu0 %1727 }
 0x910   : > { %v1733_v35 = vsel %vm752_vm2, %v1728_v16, 0 }
 0x911   : > { %v1515_v11 = vpack.c.bf16 %v1513_v9, %v1512_v8 }
 0x913   : > { %2648 = vmatmul.mubr.msk.bf16.vlgmr.msra.gmra.mrb[20].mxu0 %vm854_vm3, %v1515_v11  ;;  %v1675_v17 = vpop.permute.xlu0 %1674 }
 0x914   : > { %2658 = vmatpush3.bf16.xpose.msra.mxu0 %v1682_v12  ;;  %2659 = vmatprep.mubr.msk.bf16.mxu0 %vm2929_vm1, %v2928_v62 }
 0x915   : > { %2669 = vmatprep.subr.bf16.mxu0 %v2928_v62 }
 0x917   : > { %v1726_v45 = vpop.permute.xlu0 %1725 }
 0x91b   : > { %2660 = vmatmul.mubr.msk.bf16.vlgmr.msra.gmra.mrb[24].mxu0 %vm752_vm2, %v1675_v17 }
 0x91c   : > { %2671 = vmatprep.mubr.msk.bf16.mxu0 %vm2929_vm1, %v2928_v62 }
 0x9de   : > { %v1556_v20 = vpop.f32.mrb[28].mxu1 }
 0x9df   : > { %v2643_v22 = vpop.f32.mrb[29].mxu1 }
 0x9e0   : > { %v1559_v23 = vpop.f32.mrb[30].mxu1 }
 0x9e1   : > { %v1610_v25 = vpack.c.bf16 %v1559_v23, %v1556_v20  ;;  %v2644_v27 = vpop.f32.mrb[31].mxu1 }
 0x9e3   : > { %2653 = vmatprep.mubr.msk.bf16.mxu1 %vm752_vm2, %v1610_v25 }
 0x9e6   : > { %v1603_v28 = vpop.f32.mrb[20].mxu0 }
 0x9e7   : > { %v2649_v30 = vpop.f32.mrb[21].mxu0 }
 0x9e8   : > { %v1606_v31 = vpop.f32.mrb[22].mxu0  ;;  %v740_v30 = vld [vmem:[%s3454_s7 + $0xc] sm:$0xf] }
 0x9e9   : > { %v1611_v32 = vpack.c.bf16 %v1606_v31, %v1603_v28  ;;  %v2650_v34 = vpop.f32.mrb[23].mxu0  ;;  %v1929_v31 = vsel %vm1253_vm4, %v740_v30, 0 }
 0x9eb   : > { %2654 = vmatmul.mubr.msk.bf16.vlgmr.msra.gmra.mrb[24].mxu1 %vm752_vm2, %v1611_v32 }
 0x9ec   : > { %2664 = vmatpush3.bf16.xpose.msra.mxu1 %v1733_v35  ;;  %2665 = vmatprep.mubr.msk.bf16.mxu1 %vm2929_vm1, %v2928_v62 }
 0x9ed   : > { %2675 = vmatprep.subr.bf16.mxu1 %v2928_v62 }
 0x9ee   : > { %v1718_v37 = vpop.f32.mrb[24].mxu0 }
 0x9ef   : > { %v1719_v39 = vadd.f32 %v1718_v37, %v735_v36  ;;  %v2661_v40 = vpop.f32.mrb[25].mxu0 }
 0x9f0   : > { %v1721_v41 = vpop.f32.mrb[26].mxu0 }
 0x9f1   : > { %v1722_v42 = vadd.f32 %v1721_v41, %v736_v38  ;;  %v2662_v43 = vpop.f32.mrb[27].mxu0  ;;  %v1776_v44 = vadd.f32 %v1719_v39, %v3154_v52 }
 0x9f3   : > { %2666 = vmatmul.mubr.msk.bf16.vlgmr.msra.gmra.mrb[32].mxu1 %vm752_vm2, %v1726_v45  ;;  %v1780_v46 = vsel %vm854_vm3, %v1776_v44, -inf  ;;  %v1777_v47 = vadd.f32 %v1722_v42, %v3150_v50 }
 0x9f4   : > { %1781 = vmax.xlane.f32.xlu0 %v1780_v46  ;;  %2677 = vmatprep.mubr.msk.bf16.mxu1 %vm2929_vm1, %v2928_v62  ;;  %v2884_v46 = vld [vmem:[%s3062_s17 + $0x10] sm:$0xff] }
 0x9f5   : > { %v1783_v49 = vsel %vm854_vm3, %v1777_v47, -inf }
 0x9f6   : > { %1784 = vmax.xlane.f32.xlu1 %v1783_v49  ;;  %v2885_v49 = vld [vmem:[%s3062_s17] sm:$0xff] }
 0xa81   : > { %v1782_v53 = vpop.xlane.xlu0 %1781 }
 0xa82   : > { %v1792_v55 = vsub.f32 %v1776_v44, %v1782_v53  ;;  %v2477_v44 = vld [vmem:[%s3455_s8] ss:$0 sm:$0xff] }
 0xa83   : > { %v1785_v58 = vpop.xlane.xlu1 %1784 }
 0xa84   : > { %v1796_v56 = vmul.f32 1.442695, %v1792_v55  ;;  %v1793_v59 = vsub.f32 %v1777_v47, %v1785_v58 }
 0xa86   : > { %2852 = vpow2.f32 %v1796_v56  ;;  %v1798_v61 = vmul.f32 1.442695, %v1793_v59  ;;  %v2887_v59 = vld [vmem:[%s3062_s17 + $0x8] sm:$0xff] }
 0xa88   : > { %2854 = vpow2.f32 %v1798_v61 }
 0xa90   : > { %v2853_v57 = vpop.eup %2852 }
 0xa91   : > { %v1804_v52 = vsel %vm854_vm3, %v2853_v57, 0.0 }
 0xa92   : > { %1805 = vadd.xlane.f32.xlu1 %v1804_v52  ;;  %v2855_v63 = vpop.eup %2854  ;;  %v2886_v52 = vld [vmem:[%s3062_s17 + $0x18] sm:$0xff] }
 0xa93   : > { %v1807_v0 = vsel %vm854_vm3, %v2855_v63, 0.0 }
 0xac6   : > { %v1769_v50 = vpop.f32.mrb[32].mxu1 }
 0xac7   : > { %v1770_v1 = vadd.f32 %v1769_v50, %v735_v36  ;;  %v2667_v2 = vpop.f32.mrb[33].mxu1 }
 0xac8   : > { %v1772_v3 = vpop.f32.mrb[34].mxu1 }
 0xac9   : > { %v1773_v62 = vadd.f32 %v1772_v3, %v736_v38  ;;  %v2668_v4 = vpop.f32.mrb[35].mxu1  ;;  %v1778_v14 = vadd.f32 %v1770_v1, %v3134_v29 }
 0xacb   : > { %v1786_v15 = vsel %vm854_vm3, %v1778_v14, -inf  ;;  %v1779_v48 = vadd.f32 %v1773_v62, %v3137_v33 }
 0xacc   : > { %1787 = vmax.xlane.f32.xlu0 %v1786_v15 }
 0xacd   : > { %v1789_v60 = vsel %vm854_vm3, %v1779_v48, -inf }
 0xad0   : > { %1790 = vmax.xlane.f32.xlu0 %v1789_v60 }
 0xad4   : > { %1808 = vadd.xlane.f32.xlu0 %v1807_v0 }
 0xb1f   : > { %v1806_v9 = vpop.xlane.xlu1 %1805 }
 0xb59   : > { %v1788_v51 = vpop.xlane.xlu0 %1787 }
 0xb5a   : > { %v1794_v21 = vsub.f32 %v1778_v14, %v1788_v51 }
 0xb5c   : > { %v1800_v24 = vmul.f32 1.442695, %v1794_v21 }
 0xb5d   : > { %v1791_v26 = vpop.xlane.xlu0 %1790 }
 0xb5e   : > { %2856 = vpow2.f32 %v1800_v24  ;;  %v1795_v54 = vsub.f32 %v1779_v48, %v1791_v26 }
 0xb60   : > { %v1802_v5 = vmul.f32 1.442695, %v1795_v54 }
 0xb61   : > { %v1809_v8 = vpop.xlane.xlu0 %1808 }
 0xb62   : > { %2858 = vpow2.f32 %v1802_v5 }
 0xb63   : > { %2860 = vrcp.f32 %v1809_v8 }
 0xb64   : > { %2862 = vrcp.f32 %v1806_v9 }
 0xb68   : > { %v2857_v29 = vpop.eup %2856 }
 0xb69   : > { %v1810_v6 = vsel %vm854_vm3, %v2857_v29, 0.0 }
 0xb6a   : > { %1811 = vadd.xlane.f32.xlu1 %v1810_v6 }
 0xb6c   : > { %v2859_v33 = vpop.eup %2858 }
 0xb6d   : > { %v1813_v7 = vsel %vm854_vm3, %v2859_v33, 0.0  ;;  %v2861_v11 = vpop.eup %2860 }
 0xb6e   : > { %1814 = vadd.xlane.f32.xlu0 %v1813_v7  ;;  %v2863_v16 = vpop.eup %2862  ;;  %v1821_v17 = vmul.f32 %v2861_v11, %v2855_v63 }
 0xb6f   : > { %v1820_v18 = vmul.f32 %v2863_v16, %v2853_v57 }
 0xb71   : > { %v1824_v22 = vpack.c.bf16 %v1821_v17, %v1820_v18  ;;  %v2786_v17 = vld [vmem:[%s3458_s11] sm:$0xff]   ;;  %v2787_v18 = vld [vmem:[%s3458_s11 + $0x8] sm:$0xff]  }
 0xb7b   : > { %1826 = vrot.lane.b32.xlu1 %v3101_v13, %s2940_s25 }
 0xb84   : > { %1873 = vrot.lane.b32.xlu0 %v3099_v10, %s2940_s25 }
 0xbf7   : > { %v1812_v12 = vpop.xlane.xlu1 %1811 }
 0xbf8   : > { %2864 = vrcp.f32 %v1812_v12 }
 0xbfb   : > { %v1827_v19 = vpop.permute.xlu1 %1826  ;;  %v1815_v20 = vpop.xlane.xlu0 %1814 }
 0xbfc   : > { %2866 = vrcp.f32 %v1815_v20  ;;  %2670 = vmatpush3.bf16.msra.mxu0 %v1827_v19 }
 0xbfd   : > { %2687 = vmatprep.subr.bf16.mxu0 %v2786_v17 }
 0xbff   : > { %2672 = vmatmul.mubr.msk.bf16.vlgmr.msra.gmra.mrb[28].mxu0 %vm854_vm3, %v1824_v22  ;;  %v1874_v13 = vpop.permute.xlu0 %1873 }
 0xc00   : > { %2676 = vmatpush3.bf16.msra.mxu1 %v1874_v13  ;;  %2688 = vmatpush3.bf16.msra.mxu0 %v2786_v17 }
 0xc01   : > { %2730 = vmatprep.subr.msk.bf16.mxu1 %vm1253_vm4, %v740_v30  ;;  %2689 = vmatprep.subr.bf16.mxu0 %v2787_v18 }
 0xc02   : > { %v2865_v10 = vpop.eup %2864 }
 0xc03   : > { %v1822_v25 = vmul.f32 %v2865_v10, %v2857_v29 }
 0xc04   : > { %2690 = vmatpush3.bf16.msra.mxu0 %v2787_v18 }
 0xc06   : > { %v2867_v23 = vpop.eup %2866 }
 0xc07   : > { %v1823_v27 = vmul.f32 %v2867_v23, %v2859_v33 }
 0xc09   : > { %v1825_v28 = vpack.c.bf16 %v1823_v27, %v1822_v25 }
 0xc0b   : > { %2678 = vmatmul.mubr.msk.bf16.vlgmr.msra.gmra.mrb[36].mxu1 %vm854_vm3, %v1825_v28 }
 0xc0c   : > { %2682 = vmatpush3.bf16.msra.mxu1 %v1929_v31 }
 0xcd2   : > { %v1866_v32 = vpop.f32.mrb[28].mxu0 }
 0xcd3   : > { %v2673_v34 = vpop.f32.mrb[29].mxu0 }
 0xcd4   : > { %v1869_v35 = vpop.f32.mrb[30].mxu0 }
 0xcd5   : > { %v1920_v36 = vpack.c.bf16 %v1869_v35, %v1866_v32  ;;  %v2674_v37 = vpop.f32.mrb[31].mxu0  ;;  %v2478_v35 = vld [vmem:[%s3456_s9] ss:$0 sm:$0xff] }
 0xcd7   : > { %2683 = vmatprep.mubr.msk.bf16.mxu1 %vm752_vm2, %v1920_v36 }
 0xcde   : > { %v1913_v38 = vpop.f32.mrb[36].mxu1 }
 0xcdf   : > { %v2679_v39 = vpop.f32.mrb[37].mxu1 }
 0xce0   : > { %v1916_v40 = vpop.f32.mrb[38].mxu1 }
 0xce1   : > { %v1921_v41 = vpack.c.bf16 %v1916_v40, %v1913_v38  ;;  %v2680_v42 = vpop.f32.mrb[39].mxu1 }
 0xce3   : > { %2684 = vmatmul.mubr.msk.bf16.vlgmr.msra.gmra.mrb[24].mxu1 %vm752_vm2, %v1921_v41  ;;  %v2479_v41 = vld [vmem:[%s3457_s10] ss:$0 sm:$0xff] }
 0xdb6   : > { %v2685_v43 = vpop.f32.mrb[24].mxu1 }
 0xdb7   : > { %v1965_v45 = vpop.f32.mrb[25].mxu1  ;;  %v1986_v47 = vadd.f32 %v2884_v46, %v2685_v43 }
 0xdb8   : > { %v1984_v53 = vadd.f32 %v2885_v49, %v1965_v45  ;;  %v2686_v55 = vpop.f32.mrb[26].mxu1 }
 0xdb9   : > { %v1968_v56 = vpop.f32.mrb[27].mxu1  ;;  %v1987_v58 = vadd.f32 %v2886_v52, %v2686_v55  ;;  %v3353_v50 = vadd.f32 %v2477_v44, %v1986_v47 }
 0xdba   : > { %v3349_v57 = vadd.f32 %v2477_v44, %v1984_v53  ;;  %v1985_v61 = vadd.f32 %v2887_v59, %v1968_v56  ;;  %v2788_v59 = vld [vmem:[%s3460_s13] sm:$0xff]  }
 0xdbb   : > { %v3359_v3 = vadd.f32 %v2477_v44, %v1987_v58  ;;  %v2007_v4 = vsel %vm571_vm0, %v3353_v50, 0.0  ;;  %2695 = vmatprep.subr.bf16.mxu0 %v2788_v59 }
 0xdbc   : > { %v3355_v1 = vadd.f32 %v2477_v44, %v1985_v61  ;;  %v2001_v2 = vsel %vm571_vm0, %v3349_v57, 0.0  ;;  %v2789_v61 = vld [vmem:[%s3460_s13 + $0x8] sm:$0xff]  }
 0xdbd   : > { %2002 = vadd.xlane.f32.xlu1 %v2001_v2  ;;  %v2010_v14 = vsel %vm571_vm0, %v3359_v3, 0.0  ;;  %v2790_v2 = vld [vmem:[%s3460_s13 + $0x10] sm:$0xff]  }
 0xdbe   : > { %v2004_v62 = vsel %vm571_vm0, %v3355_v1, 0.0 }
 0xdbf   : > { %2005 = vadd.xlane.f32.xlu0 %v2004_v62  ;;  %v2791_v62 = vld [vmem:[%s3460_s13 + $0x18] sm:$0xff]  }
 0xdc1   : > { %2008 = vadd.xlane.f32.xlu1 %v2007_v4  ;;  %v2792_v4 = vld [vmem:[%s3460_s13 + $0x20] sm:$0xff]  }
 0xdc3   : > { %2011 = vadd.xlane.f32.xlu0 %v2010_v14  ;;  %v2793_v14 = vld [vmem:[%s3460_s13 + $0x28] sm:$0xff]  }
 0xe4a   : > { %v2003_v15 = vpop.xlane.xlu1 %2002 }
 0xe4b   : > { %v2013_v48 = vmul.f32 0.03125, %v2003_v15  ;;  %v2794_v15 = vld [vmem:[%s3460_s13 + $0x30] sm:$0xff]  }
 0xe4c   : > { %v2006_v60 = vpop.xlane.xlu0 %2005 }
 0xe4d   : > { %v2017_v63 = vsub.f32 %v3349_v57, %v2013_v48  ;;  %v2014_v0 = vmul.f32 0.03125, %v2006_v60  ;;  %v2795_v48 = vld [vmem:[%s3460_s13 + $0x38] sm:$0xff]   ;;  %v2480_v60 = vld [vmem:[%s3459_s12] ss:$0 sm:$0xff] }
 0xe4e   : > { %v2009_v51 = vpop.xlane.xlu1 %2008 }
 0xe4f   : > { %v2018_v21 = vsub.f32 %v3355_v1, %v2014_v0  ;;  %v2015_v24 = vmul.f32 0.03125, %v2009_v51  ;;  %v2021_v26 = vmul.f32 %v2017_v63, %v2017_v63 }
 0xe50   : > { %v2012_v54 = vpop.xlane.xlu0 %2011 }
 0xe51   : > { %v2019_v5 = vsub.f32 %v3353_v50, %v2015_v24  ;;  %v2016_v29 = vmul.f32 0.03125, %v2012_v54  ;;  %v2025_v6 = vsel %vm571_vm0, %v2021_v26, 0.0  ;;  %v2022_v33 = vmul.f32 %v2018_v21, %v2018_v21 }
 0xe52   : > { %2026 = vadd.xlane.f32.xlu1 %v2025_v6 }
 0xe53   : > { %v2020_v7 = vsub.f32 %v3359_v3, %v2016_v29  ;;  %v2028_v8 = vsel %vm571_vm0, %v2022_v33, 0.0  ;;  %v2023_v9 = vmul.f32 %v2019_v5, %v2019_v5 }
 0xe54   : > { %2029 = vadd.xlane.f32.xlu0 %v2028_v8 }
 0xe55   : > { %v2031_v11 = vsel %vm571_vm0, %v2023_v9, 0.0  ;;  %v2024_v12 = vmul.f32 %v2020_v7, %v2020_v7 }
 0xe56   : > { %2032 = vadd.xlane.f32.xlu1 %v2031_v11 }
 0xe57   : > { %v2034_v16 = vsel %vm571_vm0, %v2024_v12, 0.0 }
 0xe58   : > { %2035 = vadd.xlane.f32.xlu0 %v2034_v16 }
 0xedf   : > { %v2027_v19 = vpop.xlane.xlu1 %2026 }
 0xee0   : > { %v2037_v20 = vmul.f32 0.03125, %v2027_v19 }
 0xee1   : > { %v2030_v22 = vpop.xlane.xlu0 %2029 }
 0xee2   : > { %v2041_v13 = vadd.f32 1e-05, %v2037_v20  ;;  %v2038_v10 = vmul.f32 0.03125, %v2030_v22 }
 0xee3   : > { %v2033_v23 = vpop.xlane.xlu1 %2032 }
 0xee4   : > { %2868 = vrsqrt.f32 %v2041_v13  ;;  %v2042_v25 = vadd.f32 1e-05, %v2038_v10  ;;  %v2039_v27 = vmul.f32 0.03125, %v2033_v23 }
 0xee5   : > { %v2036_v28 = vpop.xlane.xlu0 %2035 }
 0xee6   : > { %2870 = vrsqrt.f32 %v2042_v25  ;;  %v2043_v30 = vadd.f32 1e-05, %v2039_v27  ;;  %v2040_v31 = vmul.f32 0.03125, %v2036_v28 }
 0xee8   : > { %2872 = vrsqrt.f32 %v2043_v30  ;;  %v2044_v32 = vadd.f32 1e-05, %v2040_v31 }
 0xeea   : > { %2874 = vrsqrt.f32 %v2044_v32 }
 0xeee   : > { %v2869_v34 = vpop.eup %2868 }
 0xeef   : > { %v2049_v36 = vmul.f32 %v2869_v34, %v2017_v63 }
 0xef0   : > { %v2871_v37 = vpop.eup %2870 }
 0xef1   : > { %v2050_v38 = vmul.f32 %v2871_v37, %v2018_v21  ;;  %v2059_v39 = vmul.f32 %v2478_v35, %v2049_v36 }
 0xef2   : > { %v2873_v40 = vpop.eup %2872 }
 0xef3   : > { %v2051_v42 = vmul.f32 %v2873_v40, %v2019_v5  ;;  %v2060_v43 = vmul.f32 %v2478_v35, %v2050_v38  ;;  %v2069_v47 = vadd.f32 %v2479_v41, %v2059_v39 }
 0xef4   : > { %v2875_v44 = vpop.eup %2874 }
 0xef5   : > { %v2061_v45 = vmul.f32 %v2478_v35, %v2051_v42  ;;  %v2052_v46 = vmul.f32 %v2875_v44, %v2020_v7  ;;  %v2070_v49 = vadd.f32 %v2479_v41, %v2060_v43 }
 0xef7   : > { %v2062_v53 = vmul.f32 %v2478_v35, %v2052_v46  ;;  %v2073_v55 = vpack.c.bf16 %v2070_v49, %v2069_v47  ;;  %v2071_v56 = vadd.f32 %v2479_v41, %v2061_v45 }
 0xef9   : > { %2691 = vmatprep.mubr.msk.bf16.mxu0 %vm571_vm0, %v2073_v55  ;;  %v2072_v52 = vadd.f32 %v2479_v41, %v2062_v53  ;;  %v2485_v53 = vld [vmem:[%s3461_s14] ss:$0 sm:$0xff] }
 0xefb   : > { %v2074_v58 = vpack.c.bf16 %v2072_v52, %v2071_v56 }
 0xefd   : > { %2692 = vmatmul.mubr.msk.bf16.vlgmr.msra.gmra.mrb[32].mxu0 %vm571_vm0, %v2074_v58 }
 0xefe   : > { %2696 = vmatpush3.bf16.msra.mxu0 %v2788_v59 }
 0xeff   : > { %2697 = vmatprep.subr.bf16.mxu0 %v2789_v61 }
 0xf02   : > { %2698 = vmatpush3.bf16.msra.mxu0 %v2789_v61 }
 0xf03   : > { %2699 = vmatprep.subr.bf16.mxu0 %v2790_v2 }
 0xf06   : > { %2700 = vmatpush3.bf16.msra.mxu0 %v2790_v2 }
 0xf07   : > { %2701 = vmatprep.subr.bf16.mxu0 %v2791_v62 }
 0xf0a   : > { %2702 = vmatpush3.bf16.msra.mxu0 %v2791_v62 }
 0xf0b   : > { %2703 = vmatprep.subr.bf16.mxu0 %v2792_v4 }
 0xf0e   : > { %2704 = vmatpush3.bf16.msra.mxu0 %v2792_v4 }
 0xf0f   : > { %2705 = vmatprep.subr.bf16.mxu0 %v2793_v14 }
 0xf12   : > { %2706 = vmatpush3.bf16.msra.mxu0 %v2793_v14 }
 0xf13   : > { %2707 = vmatprep.subr.bf16.mxu0 %v2794_v15 }
 0xf16   : > { %2708 = vmatpush3.bf16.msra.mxu0 %v2794_v15 }
 0xf17   : > { %2709 = vmatprep.subr.bf16.mxu0 %v2795_v48 }
 0xf1a   : > { %2710 = vmatpush3.bf16.msra.mxu0 %v2795_v48 }
 0xfd0   : > { %v2693_v63 = vpop.f32.mrb[32].mxu0 }
 0xfd1   : > { %v2147_v0 = vadd.f32 %v2693_v63, %v2480_v60  ;;  %v2138_v51 = vpop.f32.mrb[33].mxu0 }
 0xfd2   : > { %v2139_v21 = vadd.f32 %v2480_v60, %v2138_v51  ;;  %v2694_v24 = vpop.f32.mrb[34].mxu0 }
 0xfd3   : > { %v2155_v26 = vmul.f32 %v2147_v0, %v2147_v0  ;;  %v2150_v54 = vadd.f32 %v2694_v24, %v2480_v60  ;;  %v2141_v5 = vpop.f32.mrb[35].mxu0 }
 0xfd4   : > { %v2153_v29 = vmul.f32 %v2139_v21, %v2139_v21  ;;  %v2142_v6 = vadd.f32 %v2480_v60, %v2141_v5 }
 0xfd5   : > { %v2159_v33 = vmul.f32 %v2155_v26, %v2147_v0  ;;  %v2156_v7 = vmul.f32 %v2150_v54, %v2150_v54 }
 0xfd6   : > { %v2157_v8 = vmul.f32 %v2153_v29, %v2139_v21  ;;  %v2154_v9 = vmul.f32 %v2142_v6, %v2142_v6 }
 0xfd7   : > { %v2163_v11 = vmul.f32 0.044715, %v2159_v33  ;;  %v2160_v12 = vmul.f32 %v2156_v7, %v2150_v54 }
 0xfd8   : > { %v2161_v16 = vmul.f32 0.044715, %v2157_v8  ;;  %v2158_v17 = vmul.f32 %v2154_v9, %v2142_v6 }
 0xfd9   : > { %v2167_v18 = vadd.f32 %v2163_v11, %v2147_v0  ;;  %v2164_v19 = vmul.f32 0.044715, %v2160_v12 }
 0xfda   : > { %v2165_v20 = vadd.f32 %v2161_v16, %v2139_v21  ;;  %v2162_v22 = vmul.f32 0.044715, %v2158_v17 }
 0xfdb   : > { %v2171_v13 = vmul.f32 0.7978846, %v2167_v18  ;;  %v2168_v10 = vadd.f32 %v2164_v19, %v2150_v54 }
 0xfdc   : > { %v2169_v23 = vmul.f32 0.7978846, %v2165_v20  ;;  %v2166_v25 = vadd.f32 %v2162_v22, %v2142_v6 }
 0xfdd   : > { %2876 = vtanh.f32 %v2171_v13  ;;  %v2172_v27 = vmul.f32 0.7978846, %v2168_v10 }
 0xfde   : > { %2878 = vtanh.f32 %v2169_v23  ;;  %v2170_v28 = vmul.f32 0.7978846, %v2166_v25 }
 0xfdf   : > { %2880 = vtanh.f32 %v2172_v27 }
 0xfe0   : > { %2882 = vtanh.f32 %v2170_v28 }
 0xfe7   : > { %v2877_v30 = vpop.eup %2876 }
 0xfe8   : > { %v2879_v31 = vpop.eup %2878  ;;  %v2179_v32 = vadd.f32 1.0, %v2877_v30 }
 0xfe9   : > { %v2881_v34 = vpop.eup %2880  ;;  %v2177_v35 = vadd.f32 1.0, %v2879_v31 }
 0xfea   : > { %v2883_v36 = vpop.eup %2882  ;;  %v2183_v37 = vmul.f32 0.5, %v2179_v32  ;;  %v2180_v38 = vadd.f32 1.0, %v2881_v34 }
 0xfeb   : > { %v2178_v39 = vadd.f32 1.0, %v2883_v36  ;;  %v2181_v40 = vmul.f32 0.5, %v2177_v35 }
 0xfec   : > { %v2184_v41 = vmul.f32 0.5, %v2180_v38  ;;  %v2187_v43 = vmul.f32 %v2183_v37, %v2147_v0 }
 0xfed   : > { %v2182_v42 = vmul.f32 0.5, %v2178_v39  ;;  %v2185_v45 = vmul.f32 %v2181_v40, %v2139_v21 }
 0xfee   : > { %v2188_v44 = vmul.f32 %v2184_v41, %v2150_v54 }
 0xfef   : > { %v2186_v46 = vmul.f32 %v2182_v42, %v2142_v6 }
 0xff0   : > { %v2190_v47 = vpack.c.bf16 %v2188_v44, %v2187_v43 }
 0xff1   : > { %v2189_v49 = vpack.c.bf16 %v2186_v46, %v2185_v45 }
 0xff3   : > { %2711 = vmatprep.mubr.bf16.mxu0 %v2189_v49 }
 0xff4   : > { %2712 = vmatmul.mubr.bf16.vlgmr.msra.gmra.mrb[36].mxu0 %v2190_v47 }
0x10c7   : > { %v2713_v55 = vpop.f32.mrb[36].mxu0 }
0x10c8   : > { %v2305_v56 = vadd.f32 %v2713_v55, %v2485_v53  ;;  %v2296_v52 = vpop.f32.mrb[37].mxu0 }
0x10c9   : > { %v2297_v58 = vadd.f32 %v2485_v53, %v2296_v52  ;;  %v2714_v59 = vpop.f32.mrb[38].mxu0 }
0x10ca   : > { %v2313_v61 = vadd.f32 %v2305_v56, %v3353_v50  ;;  %v2308_v2 = vadd.f32 %v2714_v59, %v2485_v53  ;;  %v2299_v62 = vpop.f32.mrb[39].mxu0 }
0x10cb   : > { %v2311_v4 = vadd.f32 %v2297_v58, %v3349_v57  ;;  %v2300_v14 = vadd.f32 %v2485_v53, %v2299_v62 }
0x10cc   : > { %2317 = vst.msk [vmem:[%s562_s19 + $0x10] sm:$0xff] %vm571_vm0, %v2313_v61  ;;  %v2314_v15 = vadd.f32 %v2308_v2, %v3359_v3 }
0x10cd   : > { %2315 = vst.msk [vmem:[%s562_s19] sm:$0xff] %vm571_vm0, %v2311_v4  ;;  %v2312_v48 = vadd.f32 %v2300_v14, %v3355_v1 }
0x10ce   : > { %2318 = vst.msk [vmem:[%s562_s19 + $0x18] sm:$0xff] %vm571_vm0, %v2314_v15 }
0x10cf   : > { %2316 = vst.msk [vmem:[%s562_s19 + $0x8] sm:$0xff] %vm571_vm0, %v2312_v48 }
0x10d0 PF: > { %s25_s22 = sadd.s32 1, %s2926_s22   ;;  %s3467_s18 = smov %s2918_s20 }
0x10d1   : > { %p22_p7 = scmp.ge.s32.totalorder %s25_s22, 6   ;;  %s3468_s19 = smov %s2922_s21 }
0x10d2   : > { %s3469_s20 = smov %s3472_s23  ;;  %s3470_s21 = smov %s3476_s24 }
0x10d3   :  { %24 = sbr.rel (!%p22_p7) target bundleno = 3 (0x3), region = 113 }

</bundles_post_ra>
